<compile_context>
chip_gen: v5e
topology: v5e:2x2
jax: 0.10.0
libtpu: 0.0.40
codegen_flags: <defaults>
</compile_context>

<pallas_src>
import numpy as np
import jax
import jax.numpy as jnp
from jax.experimental import pallas as pl
from jax.experimental.pallas import tpu as pltpu

FEAT_DIM = 768


# ----------------------------------------------------------------------------
# Pallas kernels
# ----------------------------------------------------------------------------

def _head_kernel(p_ref, we_ref, tw_ref, tb_ref, o_ref):
    """Fused patch-embed + 1x1-conv head + sigmoid + (1 - sigmoid).

    p_ref  : (Kp, M)   patches, feature-major (M = num pixels, lane dim)
    we_ref : (768, Kp) patch-embedding weight (stand-in backbone)
    tw_ref : (1, 768)  tMod 1x1-conv weight (lane-major)
    tb_ref : (1, 1)    tMod bias
    o_ref  : (3, M)    rows = [y, fc, bc], lane-dense single store
    """
    feats = jnp.dot(we_ref[...], p_ref[...],
                    preferred_element_type=jnp.float32)          # (768, M)
    y = jnp.dot(tw_ref[...], feats,
                preferred_element_type=jnp.float32) + tb_ref[...]  # (1, M)
    fc = jax.nn.sigmoid(y)
    o_ref[...] = jnp.concatenate([y, fc, 1.0 - fc], axis=0)        # (3, M)


def head_apply(patches_t, w_embed_t, tmod_w, tmod_b):
    # patches_t: (Kp, M); single full block (M is tiny here, cannot be lane-split
    # into 128-multiples, so no grid).
    _, m = patches_t.shape
    return pl.pallas_call(
        _head_kernel,
        out_shape=jax.ShapeDtypeStruct((3, m), jnp.float32),
    )(patches_t, w_embed_t, tmod_w, tmod_b)


def _resize_kernel(x_ref, r_ref, ct_ref, o_ref):
    """Separable bicubic resize, batched: out[n] = R @ x[n] @ C^T."""
    x = x_ref[...]                                   # (Nb, Hin, Win)
    r = r_ref[...]                                   # (Ho, Hin)
    ct = ct_ref[...]                                 # (Win, Wo)
    nb = x.shape[0]
    ct_b = jnp.broadcast_to(ct, (nb,) + ct.shape)    # hoisted, done once
    r_b = jnp.broadcast_to(r, (nb,) + r.shape)
    # column stage then row stage, both as batched MXU matmuls
    xc = jnp.einsum('nhw,nwv->nhv', x, ct_b, preferred_element_type=jnp.float32)
    o_ref[...] = jnp.einsum('noh,nhv->nov', r_b, xc,
                            preferred_element_type=jnp.float32)


def _disc_kernel(xf_ref, fcm_ref, bcm_ref, wx_ref, wm_ref, b_ref, o_ref):
    """Fused 4-way discriminator (stand-in: linear + sigmoid).

    xf_ref  : (2B, Cx)  down-sampled images, rows = [crop1 samples, crop2 samples]
    fcm_ref : (2B, Cm)  foreground maps, same row order
    bcm_ref : (2B, Cm)  background maps
    wx/wm   : (1, Cx)/(1, Cm) lane-major weight split (image part / map part)
    o_ref   : (2B, 1)   rows = [vld_fc (B), vld_bc (B)]
    """
    w_x = wx_ref[...]
    w_m = wm_ref[...]
    b = b_ref[...]
    sx = jnp.sum(xf_ref[...] * w_x, axis=-1, keepdims=True)     # (2B, 1) shared
    s_fc = jnp.sum(fcm_ref[...] * w_m, axis=-1, keepdims=True)
    s_bc = jnp.sum(bcm_ref[...] * w_m, axis=-1, keepdims=True)
    v_fc = jax.nn.sigmoid(sx + s_fc + b)
    v_bc = jax.nn.sigmoid(sx + s_bc + b)
    half = xf_ref.shape[0] // 2
    vld_fc = 0.5 * (v_fc[:half] + v_fc[half:])                   # (B, 1)
    vld_bc = 0.5 * (v_bc[:half] + v_bc[half:])
    o_ref[...] = jnp.concatenate([vld_fc, vld_bc], axis=0)       # (2B, 1)


def disc_apply(xflat, fc_maps, bc_maps, disc_wx, disc_wm, disc_b):
    n2b = xflat.shape[0]
    return pl.pallas_call(
        _disc_kernel,
        out_shape=jax.ShapeDtypeStruct((n2b, 1), jnp.float32),
    )(xflat, fc_maps, bc_maps, disc_wx, disc_wm, disc_b)


# ----------------------------------------------------------------------------
# Bicubic interpolation matrices (PyTorch semantics, align_corners=False, a=-0.75)
# ----------------------------------------------------------------------------

def bicubic_matrix(in_size, out_size, scale):
    A = -0.75

    def c1(x):  # |x| <= 1
        return ((A + 2.0) * x - (A + 3.0)) * x * x + 1.0

    def c2(x):  # 1 < |x| < 2
        return ((A * x - 5.0 * A) * x + 8.0 * A) * x - 4.0 * A

    m = np.zeros((out_size, in_size), dtype=np.float32)
    for o in range(out_size):
        src = scale * (o + 0.5) - 0.5
        i0 = int(np.floor(src))
        t = src - i0
        ws = [c2(t + 1.0), c1(t), c1(1.0 - t), c2(2.0 - t)]
        for k, w in enumerate(ws):
            idx = min(max(i0 - 1 + k, 0), in_size - 1)
            m[o, idx] += w
    return jnp.asarray(m)


def pallas_resize_bicubic(x_nhw, out_h, out_w, scale_h, scale_w):
    # x_nhw: (N, Hin, Win) float32 -> (N, out_h, out_w)
    n, hin, win = x_nhw.shape
    r = bicubic_matrix(hin, out_h, scale_h)          # (out_h, Hin)
    ct = bicubic_matrix(win, out_w, scale_w).T       # (Win, out_w)
    nblk = 2 if (n % 2 == 0 and n >= 2) else 1       # shard over 2 TCs on v7x
    nb = n // nblk
    return pl.pallas_call(
        _resize_kernel,
        grid=(nblk,),
        in_specs=[
            pl.BlockSpec((nb, hin, win), lambda i: (i, 0, 0)),
            pl.BlockSpec((out_h, hin), lambda i: (0, 0)),   # constant -> resident
            pl.BlockSpec((win, out_w), lambda i: (0, 0)),   # constant -> resident
        ],
        out_specs=pl.BlockSpec((nb, out_h, out_w), lambda i: (i, 0, 0)),
        out_shape=jax.ShapeDtypeStruct((n, out_h, out_w), jnp.float32),
        compiler_params=pltpu.CompilerParams(dimension_semantics=("parallel",)),
    )(x_nhw, r, ct)


# ----------------------------------------------------------------------------
# Model
# ----------------------------------------------------------------------------

def extract_patches_t(x, patch_size):
    """(N, C, H, W) -> (C*p*p, N*hp*wp), feature-major (lane dim = pixels)."""
    n, c, h, w = x.shape
    hp, wp = h // patch_size, w // patch_size
    xp = x.reshape(n, c, hp, patch_size, wp, patch_size)
    xp = xp.transpose(1, 3, 5, 0, 2, 4)              # (C, p, p, N, hp, wp)
    return xp.reshape(c * patch_size * patch_size, n * hp * wp)


def ucosda_forward(params, x_c1, x_c2=None, *, patch_size=8, train_size=32):
    hp = train_size // patch_size
    b, c, h, w = x_c1.shape

    def run_head(x_all):
        # TODO(synk): real sMod is the pretrained DINO ViT-B/8 ('k' features);
        # stand-in = deterministic patch-embedding projection (same shapes).
        patches_t = extract_patches_t(x_all, patch_size)
        return head_apply(patches_t, params["w_embed_t"],
                          params["tmod_w"], params["tmod_b"])

    def up(y_nhw):   # F.interpolate(size=train_size, mode='bicubic', align_corners=False)
        return pallas_resize_bicubic(y_nhw, train_size, train_size,
                                     hp / train_size, hp / train_size)

    if x_c2 is None:
        slab = run_head(x_c1)                        # (3, B*hp*hp)
        y = slab[0].reshape(b, hp, hp)
        return up(y).reshape(b, 1, train_size, train_size)

    # -- dual-crop branch: stack both crops so every stage is one kernel call --
    x_all = jnp.concatenate([x_c1, x_c2], axis=0)    # (2B, C, H, W)
    slab = run_head(x_all)                            # (3, 2B*hp*hp)

    # down-sample both crops in one call: nn.Upsample(scale_factor=1/patch_size)
    x_small = pallas_resize_bicubic(
        x_all.reshape(2 * b * c, h, w),
        h // patch_size, w // patch_size, float(patch_size), float(patch_size))
    xflat = x_small.reshape(2 * b, c * hp * hp)       # per-sample CHW flatten

    fc_maps = slab[1].reshape(2 * b, hp * hp)         # rows: [fc1(B), fc2(B)]
    bc_maps = slab[2].reshape(2 * b, hp * hp)         # rows: [bc1(B), bc2(B)]

    # TODO(synk): Discriminator class not provided; stand-in = flatten->linear->sigmoid.
    vld = disc_apply(xflat, fc_maps, bc_maps,
                     params["disc_wx"], params["disc_wm"], params["disc_b"])
    vld_fc = vld[:b]                                  # (B, 1)
    vld_bc = vld[b:]                                  # (B, 1)

    # up-sample both logit maps in one call
    y_all = slab[0].reshape(2 * b, hp, hp)
    y_up = up(y_all)                                  # (2B, ts, ts)
    y_c1 = y_up[:b].reshape(b, 1, train_size, train_size)
    y_c2 = y_up[b:].reshape(b, 1, train_size, train_size)
    return y_c1, vld_fc, y_c2, vld_bc


def init_params(key, patch_size=8, train_size=32, channels=3):
    hp = train_size // patch_size
    kp = channels * patch_size * patch_size
    k1, k2, k3, k4 = jax.random.split(key, 4)
    return {
        "w_embed_t": 0.02 * jax.random.normal(k1, (FEAT_DIM, kp), jnp.float32),
        "tmod_w": 0.02 * jax.random.normal(k2, (1, FEAT_DIM), jnp.float32),
        "tmod_b": jnp.full((1, 1), 0.01, jnp.float32),
        "disc_wx": 0.05 * jax.random.normal(k3, (1, channels * hp * hp), jnp.float32),
        "disc_wm": 0.05 * jax.random.normal(k4, (1, hp * hp), jnp.float32),
        "disc_b": jnp.zeros((1, 1), jnp.float32),
    }


if __name__ == "__main__":
    PATCH = 8
    TRAIN = 32
    B = 2

    key = jax.random.PRNGKey(0)
    kx1, kx2, kparam = jax.random.split(key, 3)
    x_c1 = jax.random.uniform(kx1, (B, 3, TRAIN, TRAIN), jnp.float32)
    x_c2 = jax.random.uniform(kx2, (B, 3, TRAIN, TRAIN), jnp.float32)
    params = init_params(kparam, PATCH, TRAIN)

    fwd = jax.jit(ucosda_forward, static_argnames=("patch_size", "train_size"))

    y_c1, vld_fc, y_c2, vld_bc = fwd(params, x_c1, x_c2,
                                     patch_size=PATCH, train_size=TRAIN)
    jax.block_until_ready((y_c1, vld_fc, y_c2, vld_bc))

    assert y_c1.shape == (B, 1, TRAIN, TRAIN)
    assert y_c2.shape == (B, 1, TRAIN, TRAIN)
    assert vld_fc.shape == (B, 1) and vld_bc.shape == (B, 1)

    # single-input branch
    y_only = jax.block_until_ready(
        fwd(params, x_c1, None, patch_size=PATCH, train_size=TRAIN))
    assert y_only.shape == (B, 1, TRAIN, TRAIN)

    print("KERNEL_OK")
</pallas_src>

<mosaic_0001>
module attributes {stable_mosaic.version = 11 : i64} {
  func.func @_resize_kernel(%arg0: i32, %arg1: memref<6x32x32xf32, #tpu.memory_space<vmem>>, %arg2: memref<4x32xf32, #tpu.memory_space<vmem>>, %arg3: memref<32x4xf32, #tpu.memory_space<vmem>>, %arg4: memref<6x4x4xf32, #tpu.memory_space<vmem>>) attributes {dimension_semantics = [#tpu.dimension_semantics<parallel>], iteration_bounds = array<i64: 2>, scalar_prefetch = 0 : i64, scratch_operands = 0 : i64, tpu.core_type = #tpu.core_type<tc>, window_params = [{transform_indices = @transform_0, window_bounds = array<i64: 6, 32, 32>}, {pipeline_mode = #tpu.pipeline_mode<synchronous>, transform_indices = @transform_1, window_bounds = array<i64: 4, 32>}, {pipeline_mode = #tpu.pipeline_mode<synchronous>, transform_indices = @transform_2, window_bounds = array<i64: 32, 4>}, {transform_indices = @transform_3, window_bounds = array<i64: 6, 4, 4>}]} {
    %c0 = arith.constant 0 : index
    %c0_0 = arith.constant 0 : index
    %c0_1 = arith.constant 0 : index
    %0 = vector.load %arg1[%c0, %c0_0, %c0_1] : memref<6x32x32xf32, #tpu.memory_space<vmem>>, vector<6x32x32xf32>
    %c0_2 = arith.constant 0 : index
    %c0_3 = arith.constant 0 : index
    %1 = vector.load %arg2[%c0_2, %c0_3] : memref<4x32xf32, #tpu.memory_space<vmem>>, vector<4x32xf32>
    %c0_4 = arith.constant 0 : index
    %c0_5 = arith.constant 0 : index
    %2 = vector.load %arg3[%c0_4, %c0_5] : memref<32x4xf32, #tpu.memory_space<vmem>>, vector<32x4xf32>
    %3 = vector.shape_cast %2 : vector<32x4xf32> to vector<1x32x4xf32>
    %4 = vector.broadcast %3 : vector<1x32x4xf32> to vector<6x32x4xf32>
    %5 = vector.shape_cast %1 : vector<4x32xf32> to vector<1x4x32xf32>
    %6 = vector.broadcast %5 : vector<1x4x32xf32> to vector<6x4x32xf32>
    "tpu.trace_start"() <{level = 10 : i32, message = "nhw,nwv->nhv"}> : () -> ()
    %cst = arith.constant dense<0.000000e+00> : vector<6x32x4xf32>
    %7 = tpu.matmul %0, %4, %cst {dimension_numbers = #tpu.dot_dimension_numbers<[2], [1], [1], [2], [0, 0, 0, 1, 1, 2], [0], [0]>} : vector<6x32x32xf32>, vector<6x32x4xf32>, vector<6x32x4xf32> -> vector<6x32x4xf32>
    "tpu.trace_stop"() : () -> ()
    "tpu.trace_start"() <{level = 10 : i32, message = "noh,nhv->nov"}> : () -> ()
    %cst_6 = arith.constant dense<0.000000e+00> : vector<6x4x4xf32>
    %8 = tpu.matmul %6, %7, %cst_6 {dimension_numbers = #tpu.dot_dimension_numbers<[2], [1], [1], [2], [0, 0, 0, 1, 1, 2], [0], [0]>} : vector<6x4x32xf32>, vector<6x32x4xf32>, vector<6x4x4xf32> -> vector<6x4x4xf32>
    "tpu.trace_stop"() : () -> ()
    %c0_7 = arith.constant 0 : index
    %c0_8 = arith.constant 0 : index
    %c0_9 = arith.constant 0 : index
    %9 = vector.load %arg4[%c0_7, %c0_8, %c0_9] : memref<6x4x4xf32, #tpu.memory_space<vmem>>, vector<6x4x4xf32>
    tpu.vector_store %arg4[%c0_7, %c0_8, %c0_9], %8 {strides = array<i32>} : memref<6x4x4xf32, #tpu.memory_space<vmem>>, vector<6x4x4xf32>,
    return
  }
  func.func @transform_0(%arg0: i32) -> (i32, i32, i32) {
    %c0_i32 = arith.constant 0 : i32
    %c0_i32_0 = arith.constant 0 : i32
    %c0_i32_1 = arith.constant 0 : i32
    return %arg0, %c0_i32, %c0_i32_0 : i32, i32, i32
  }
  func.func @transform_1(%arg0: i32) -> (i32, i32) {
    %c0_i32 = arith.constant 0 : i32
    %c0_i32_0 = arith.constant 0 : i32
    %c0_i32_1 = arith.constant 0 : i32
    return %c0_i32, %c0_i32_0 : i32, i32
  }
  func.func @transform_2(%arg0: i32) -> (i32, i32) {
    %c0_i32 = arith.constant 0 : i32
    %c0_i32_0 = arith.constant 0 : i32
    %c0_i32_1 = arith.constant 0 : i32
    return %c0_i32, %c0_i32_0 : i32, i32
  }
  func.func @transform_3(%arg0: i32) -> (i32, i32, i32) {
    %c0_i32 = arith.constant 0 : i32
    %c0_i32_0 = arith.constant 0 : i32
    %c0_i32_1 = arith.constant 0 : i32
    return %arg0, %c0_i32, %c0_i32_0 : i32, i32, i32
  }
}

module attributes {stable_mosaic.version = 11 : i64} {
  func.func @_head_kernel(%arg0: memref<192x64xf32, #tpu.memory_space<vmem>>, %arg1: memref<768x192xf32, #tpu.memory_space<vmem>>, %arg2: memref<1x768xf32, #tpu.memory_space<vmem>>, %arg3: memref<1x1xf32, #tpu.memory_space<vmem>>, %arg4: memref<3x64xf32, #tpu.memory_space<vmem>>) attributes {dimension_semantics = [], scalar_prefetch = 0 : i64, scratch_operands = 0 : i64, tpu.core_type = #tpu.core_type<tc>} {
    %c0 = arith.constant 0 : index
    %c0_0 = arith.constant 0 : index
    %0 = vector.load %arg1[%c0, %c0_0] : memref<768x192xf32, #tpu.memory_space<vmem>>, vector<768x192xf32>
    %c0_1 = arith.constant 0 : index
    %c0_2 = arith.constant 0 : index
    %1 = vector.load %arg0[%c0_1, %c0_2] : memref<192x64xf32, #tpu.memory_space<vmem>>, vector<192x64xf32>
    %cst = arith.constant dense<0.000000e+00> : vector<768x64xf32>
    %2 = tpu.matmul %0, %1, %cst {dimension_numbers = #tpu.dot_dimension_numbers<[1], [0], [0], [1], [0, 0, 1, 1], [], []>} : vector<768x192xf32>, vector<192x64xf32>, vector<768x64xf32> -> vector<768x64xf32>
    %c0_3 = arith.constant 0 : index
    %c0_4 = arith.constant 0 : index
    %3 = vector.load %arg2[%c0_3, %c0_4] : memref<1x768xf32, #tpu.memory_space<vmem>>, vector<1x768xf32>
    %cst_5 = arith.constant dense<0.000000e+00> : vector<1x64xf32>
    %4 = tpu.matmul %3, %2, %cst_5 {dimension_numbers = #tpu.dot_dimension_numbers<[1], [0], [0], [1], [0, 0, 1, 1], [], []>} : vector<1x768xf32>, vector<768x64xf32>, vector<1x64xf32> -> vector<1x64xf32>
    %c0_6 = arith.constant 0 : index
    %c0_7 = arith.constant 0 : index
    %5 = vector.load %arg3[%c0_6, %c0_7] : memref<1x1xf32, #tpu.memory_space<vmem>>, vector<1x1xf32>
    %6 = vector.broadcast %5 : vector<1x1xf32> to vector<1x64xf32>
    %7 = arith.addf %4, %6 : vector<1x64xf32>
    %8 = arith.negf %7 : vector<1x64xf32>
    %9 = math.exp %8 : vector<1x64xf32>
    %cst_8 = arith.constant 1.000000e+00 : f32
    %10 = vector.broadcast %cst_8 : f32 to vector<1x64xf32>
    %11 = arith.addf %10, %9 : vector<1x64xf32>
    %12 = arith.divf %10, %11 : vector<1x64xf32>
    %cst_9 = arith.constant 1.000000e+00 : f32
    %13 = vector.broadcast %cst_9 : f32 to vector<1x64xf32>
    %14 = arith.subf %13, %12 : vector<1x64xf32>
    %15 = tpu.concatenate %7, %12, %14 in 0 : vector<1x64xf32>, vector<1x64xf32>, vector<1x64xf32> -> vector<3x64xf32>
    %c0_10 = arith.constant 0 : index
    %c0_11 = arith.constant 0 : index
    %16 = vector.load %arg4[%c0_10, %c0_11] : memref<3x64xf32, #tpu.memory_space<vmem>>, vector<3x64xf32>
    tpu.vector_store %arg4[%c0_10, %c0_11], %15 {strides = array<i32>} : memref<3x64xf32, #tpu.memory_space<vmem>>, vector<3x64xf32>,
    return
  }
}

module attributes {stable_mosaic.version = 11 : i64} {
  func.func @_disc_kernel(%arg0: memref<4x48xf32, #tpu.memory_space<vmem>>, %arg1: memref<4x16xf32, #tpu.memory_space<vmem>>, %arg2: memref<4x16xf32, #tpu.memory_space<vmem>>, %arg3: memref<1x48xf32, #tpu.memory_space<vmem>>, %arg4: memref<1x16xf32, #tpu.memory_space<vmem>>, %arg5: memref<1x1xf32, #tpu.memory_space<vmem>>, %arg6: memref<4x1xf32, #tpu.memory_space<vmem>>) attributes {dimension_semantics = [], scalar_prefetch = 0 : i64, scratch_operands = 0 : i64, tpu.core_type = #tpu.core_type<tc>} {
    %c0 = arith.constant 0 : index
    %c0_0 = arith.constant 0 : index
    %0 = vector.load %arg3[%c0, %c0_0] : memref<1x48xf32, #tpu.memory_space<vmem>>, vector<1x48xf32>
    %c0_1 = arith.constant 0 : index
    %c0_2 = arith.constant 0 : index
    %1 = vector.load %arg4[%c0_1, %c0_2] : memref<1x16xf32, #tpu.memory_space<vmem>>, vector<1x16xf32>
    %c0_3 = arith.constant 0 : index
    %c0_4 = arith.constant 0 : index
    %2 = vector.load %arg5[%c0_3, %c0_4] : memref<1x1xf32, #tpu.memory_space<vmem>>, vector<1x1xf32>
    %c0_5 = arith.constant 0 : index
    %c0_6 = arith.constant 0 : index
    %3 = vector.load %arg0[%c0_5, %c0_6] : memref<4x48xf32, #tpu.memory_space<vmem>>, vector<4x48xf32>
    %4 = vector.broadcast %0 : vector<1x48xf32> to vector<4x48xf32>
    %5 = arith.mulf %3, %4 : vector<4x48xf32>
    %cst = arith.constant dense<0.000000e+00> : vector<4xf32>
    %6 = vector.multi_reduction <add>, %5, %cst [1] : vector<4x48xf32> to vector<4xf32>
    %7 = vector.shape_cast %6 : vector<4xf32> to vector<4x1xf32>
    %c0_7 = arith.constant 0 : index
    %c0_8 = arith.constant 0 : index
    %8 = vector.load %arg1[%c0_7, %c0_8] : memref<4x16xf32, #tpu.memory_space<vmem>>, vector<4x16xf32>
    %9 = vector.broadcast %1 : vector<1x16xf32> to vector<4x16xf32>
    %10 = arith.mulf %8, %9 : vector<4x16xf32>
    %cst_9 = arith.constant dense<0.000000e+00> : vector<4xf32>
    %11 = vector.multi_reduction <add>, %10, %cst_9 [1] : vector<4x16xf32> to vector<4xf32>
    %12 = vector.shape_cast %11 : vector<4xf32> to vector<4x1xf32>
    %c0_10 = arith.constant 0 : index
    %c0_11 = arith.constant 0 : index
    %13 = vector.load %arg2[%c0_10, %c0_11] : memref<4x16xf32, #tpu.memory_space<vmem>>, vector<4x16xf32>
    %14 = vector.broadcast %1 : vector<1x16xf32> to vector<4x16xf32>
    %15 = arith.mulf %13, %14 : vector<4x16xf32>
    %cst_12 = arith.constant dense<0.000000e+00> : vector<4xf32>
    %16 = vector.multi_reduction <add>, %15, %cst_12 [1] : vector<4x16xf32> to vector<4xf32>
    %17 = vector.shape_cast %16 : vector<4xf32> to vector<4x1xf32>
    %18 = arith.addf %7, %12 : vector<4x1xf32>
    %19 = vector.broadcast %2 : vector<1x1xf32> to vector<4x1xf32>
    %20 = arith.addf %18, %19 : vector<4x1xf32>
    %21 = arith.negf %20 : vector<4x1xf32>
    %22 = math.exp %21 : vector<4x1xf32>
    %cst_13 = arith.constant 1.000000e+00 : f32
    %23 = vector.broadcast %cst_13 : f32 to vector<4x1xf32>
    %24 = arith.addf %23, %22 : vector<4x1xf32>
    %25 = arith.divf %23, %24 : vector<4x1xf32>
    %26 = arith.addf %7, %17 : vector<4x1xf32>
    %27 = vector.broadcast %2 : vector<1x1xf32> to vector<4x1xf32>
    %28 = arith.addf %26, %27 : vector<4x1xf32>
    %29 = arith.negf %28 : vector<4x1xf32>
    %30 = math.exp %29 : vector<4x1xf32>
    %cst_14 = arith.constant 1.000000e+00 : f32
    %31 = vector.broadcast %cst_14 : f32 to vector<4x1xf32>
    %32 = arith.addf %31, %30 : vector<4x1xf32>
    %33 = arith.divf %31, %32 : vector<4x1xf32>
    %34 = vector.extract_strided_slice %25 {offsets = [0, 0], sizes = [2, 1], strides = [1, 1]} : vector<4x1xf32> to vector<2x1xf32>
    %35 = vector.extract_strided_slice %25 {offsets = [2, 0], sizes = [2, 1], strides = [1, 1]} : vector<4x1xf32> to vector<2x1xf32>
    %36 = arith.addf %34, %35 : vector<2x1xf32>
    %cst_15 = arith.constant 5.000000e-01 : f32
    %37 = vector.broadcast %cst_15 : f32 to vector<2x1xf32>
    %38 = arith.mulf %37, %36 : vector<2x1xf32>
    %39 = vector.extract_strided_slice %33 {offsets = [0, 0], sizes = [2, 1], strides = [1, 1]} : vector<4x1xf32> to vector<2x1xf32>
    %40 = vector.extract_strided_slice %33 {offsets = [2, 0], sizes = [2, 1], strides = [1, 1]} : vector<4x1xf32> to vector<2x1xf32>
    %41 = arith.addf %39, %40 : vector<2x1xf32>
    %cst_16 = arith.constant 5.000000e-01 : f32
    %42 = vector.broadcast %cst_16 : f32 to vector<2x1xf32>
    %43 = arith.mulf %42, %41 : vector<2x1xf32>
    %44 = tpu.concatenate %38, %43 in 0 : vector<2x1xf32>, vector<2x1xf32> -> vector<4x1xf32>
    %c0_17 = arith.constant 0 : index
    %c0_18 = arith.constant 0 : index
    %45 = vector.load %arg6[%c0_17, %c0_18] : memref<4x1xf32, #tpu.memory_space<vmem>>, vector<4x1xf32>
    tpu.vector_store %arg6[%c0_17, %c0_18], %44 {strides = array<i32>} : memref<4x1xf32, #tpu.memory_space<vmem>>, vector<4x1xf32>,
    return
  }
}

module attributes {stable_mosaic.version = 11 : i64} {
  func.func @_resize_kernel(%arg0: i32, %arg1: memref<2x4x4xf32, #tpu.memory_space<vmem>>, %arg2: memref<32x4xf32, #tpu.memory_space<vmem>>, %arg3: memref<4x32xf32, #tpu.memory_space<vmem>>, %arg4: memref<2x32x32xf32, #tpu.memory_space<vmem>>) attributes {dimension_semantics = [#tpu.dimension_semantics<parallel>], iteration_bounds = array<i64: 2>, scalar_prefetch = 0 : i64, scratch_operands = 0 : i64, tpu.core_type = #tpu.core_type<tc>, window_params = [{transform_indices = @transform_0, window_bounds = array<i64: 2, 4, 4>}, {pipeline_mode = #tpu.pipeline_mode<synchronous>, transform_indices = @transform_1, window_bounds = array<i64: 32, 4>}, {pipeline_mode = #tpu.pipeline_mode<synchronous>, transform_indices = @transform_2, window_bounds = array<i64: 4, 32>}, {transform_indices = @transform_3, window_bounds = array<i64: 2, 32, 32>}]} {
    %c0 = arith.constant 0 : index
    %c0_0 = arith.constant 0 : index
    %c0_1 = arith.constant 0 : index
    %0 = vector.load %arg1[%c0, %c0_0, %c0_1] : memref<2x4x4xf32, #tpu.memory_space<vmem>>, vector<2x4x4xf32>
    %c0_2 = arith.constant 0 : index
    %c0_3 = arith.constant 0 : index
    %1 = vector.load %arg2[%c0_2, %c0_3] : memref<32x4xf32, #tpu.memory_space<vmem>>, vector<32x4xf32>
    %c0_4 = arith.constant 0 : index
    %c0_5 = arith.constant 0 : index
    %2 = vector.load %arg3[%c0_4, %c0_5] : memref<4x32xf32, #tpu.memory_space<vmem>>, vector<4x32xf32>
    %3 = vector.shape_cast %2 : vector<4x32xf32> to vector<1x4x32xf32>
    %4 = vector.broadcast %3 : vector<1x4x32xf32> to vector<2x4x32xf32>
    %5 = vector.shape_cast %1 : vector<32x4xf32> to vector<1x32x4xf32>
    %6 = vector.broadcast %5 : vector<1x32x4xf32> to vector<2x32x4xf32>
    "tpu.trace_start"() <{level = 10 : i32, message = "nhw,nwv->nhv"}> : () -> ()
    %cst = arith.constant dense<0.000000e+00> : vector<2x4x32xf32>
    %7 = tpu.matmul %0, %4, %cst {dimension_numbers = #tpu.dot_dimension_numbers<[2], [1], [1], [2], [0, 0, 0, 1, 1, 2], [0], [0]>} : vector<2x4x4xf32>, vector<2x4x32xf32>, vector<2x4x32xf32> -> vector<2x4x32xf32>
    "tpu.trace_stop"() : () -> ()
    "tpu.trace_start"() <{level = 10 : i32, message = "noh,nhv->nov"}> : () -> ()
    %cst_6 = arith.constant dense<0.000000e+00> : vector<2x32x32xf32>
    %8 = tpu.matmul %6, %7, %cst_6 {dimension_numbers = #tpu.dot_dimension_numbers<[2], [1], [1], [2], [0, 0, 0, 1, 1, 2], [0], [0]>} : vector<2x32x4xf32>, vector<2x4x32xf32>, vector<2x32x32xf32> -> vector<2x32x32xf32>
    "tpu.trace_stop"() : () -> ()
    %c0_7 = arith.constant 0 : index
    %c0_8 = arith.constant 0 : index
    %c0_9 = arith.constant 0 : index
    %9 = vector.load %arg4[%c0_7, %c0_8, %c0_9] : memref<2x32x32xf32, #tpu.memory_space<vmem>>, vector<2x32x32xf32>
    tpu.vector_store %arg4[%c0_7, %c0_8, %c0_9], %8 {strides = array<i32>} : memref<2x32x32xf32, #tpu.memory_space<vmem>>, vector<2x32x32xf32>,
    return
  }
  func.func @transform_0(%arg0: i32) -> (i32, i32, i32) {
    %c0_i32 = arith.constant 0 : i32
    %c0_i32_0 = arith.constant 0 : i32
    %c0_i32_1 = arith.constant 0 : i32
    return %arg0, %c0_i32, %c0_i32_0 : i32, i32, i32
  }
  func.func @transform_1(%arg0: i32) -> (i32, i32) {
    %c0_i32 = arith.constant 0 : i32
    %c0_i32_0 = arith.constant 0 : i32
    %c0_i32_1 = arith.constant 0 : i32
    return %c0_i32, %c0_i32_0 : i32, i32
  }
  func.func @transform_2(%arg0: i32) -> (i32, i32) {
    %c0_i32 = arith.constant 0 : i32
    %c0_i32_0 = arith.constant 0 : i32
    %c0_i32_1 = arith.constant 0 : i32
    return %c0_i32, %c0_i32_0 : i32, i32
  }
  func.func @transform_3(%arg0: i32) -> (i32, i32, i32) {
    %c0_i32 = arith.constant 0 : i32
    %c0_i32_0 = arith.constant 0 : i32
    %c0_i32_1 = arith.constant 0 : i32
    return %arg0, %c0_i32, %c0_i32_0 : i32, i32, i32
  }
}

</mosaic_0001>

<bundles_post_ra>
// kernel: ucosda_forward.5
= control target key start
LH: loop header
LB: loop body
LE: loop exit
PB: predicated region body
PF: predicated region fallthrough
CT: control target
= control target key end

     0   :  { %s716_s12 = smov 0   ;;  %s808_s0 = inlined_call_operand.vmem [shape: f32[12,32,32], index: 0, kind: input, shape index: {}]   ;;  %s809_s1 = inlined_call_operand.vmem [shape: f32[4,32], index: 1, kind: input, shape index: {}]   ;;  %s810_s2 = inlined_call_operand.vmem [shape: f32[32,4], index: 2, kind: input, shape index: {}]   ;;  %s811_s3 = inlined_call_operand.vmem [shape: f32[12,4,4], index: 3, kind: output, shape index: {}]  }
   0x1 LB: > { %s639_s13 = sadd.s32 4294967295, %s694_s12   ;;  %p643_p0 = scmp.ge.s32.totalorder %s694_s12, 1  ;;  %s694_s12 = sphi %s716_s12, %s13_s12  }
   0x2   : > { %p139_p1 = scmp.lt.s32.totalorder %s694_s12, 3 }
   0x4   : > { %p140_p2 = pnand %p643_p0, %p139_p1 }
   0x5   : > { %s164_s18 = smul.u32 (!%p140_p2), 6, %s639_s13 }
   0x6   : > { %143 = sbr.rel (%p140_p2) target bundleno = 343 (0x157), region = 32 }
   0x7   : > { %p165_p3 = scmp.lt.s32.totalorder (!%p140_p2), %s164_s18, 11 }
   0xb   : > { %v205_v0 = vld [vmem:[%s810_s2 + $0x18] sm:$0xff]  ;;  %v204_v1 = vld [vmem:[%s810_s2 + $0x10] sm:$0xff]  ;;  %v203_v2 = vld [vmem:[%s810_s2 + $0x8] sm:$0xff]  ;;  %s813_s18 = smov (!%p165_p3, %s164_s18), 11  ;;  %vm206_vm0 = vcmask 261120   ;;  %vm576_vm1 = vcmask 27648  }
   0xc   : > { %231 = vmatpush.msra.mxu0 %v205_v0  ;;  %272 = vmatpush.msra.mxu1 %v205_v0  ;;  %v202_v3 = vld [vmem:[%s810_s2] sm:$0xff]  ;;  %s679_s23 = sshll.u32 %s813_s18, 5  ;;  %s646_s29 = sshll.u32 %s813_s18, 2 }
   0xd   : > { %313 = vmatpush.msra.mxu2 %v205_v0  ;;  %354 = vmatpush.msra.mxu3 %v205_v0  ;;  %s742_s26 = scalar_lea.vmem %s808_s0, %s679_s23  ;;  %v201_v42 = vld [vmem:[%s809_s1] sm:$0xf]  ;;  %s175_s5 = scalar_lea.vmem %s811_s3, %s646_s29 }
   0xe   : > { %232 = vmatpush.msra.mxu0 %v204_v1  ;;  %273 = vmatpush.msra.mxu1 %v204_v1  ;;  %v177_v4 = vld [vmem:[%s742_s26] sm:$0xff]  ;;  %v178_v8 = vld [vmem:[%s742_s26 + $0x8] sm:$0xff]  ;;  %v179_v12 = vld [vmem:[%s742_s26 + $0x10] sm:$0xff] }
   0xf   : > { %314 = vmatpush.msra.mxu2 %v204_v1  ;;  %355 = vmatpush.msra.mxu3 %v204_v1  ;;  %v181_v5 = vld [vmem:[%s742_s26 + $0x20] sm:$0xff]  ;;  %v182_v9 = vld [vmem:[%s742_s26 + $0x28] sm:$0xff]  ;;  %v183_v13 = vld [vmem:[%s742_s26 + $0x30] sm:$0xff] }
  0x10   : > { %233 = vmatpush.msra.mxu0 %v203_v2  ;;  %274 = vmatpush.msra.mxu1 %v203_v2  ;;  %v185_v6 = vld [vmem:[%s742_s26 + $0x40] sm:$0xff]  ;;  %v186_v10 = vld [vmem:[%s742_s26 + $0x48] sm:$0xff]  ;;  %v187_v14 = vld [vmem:[%s742_s26 + $0x50] sm:$0xff] }
  0x11   : > { %315 = vmatpush.msra.mxu2 %v203_v2  ;;  %356 = vmatpush.msra.mxu3 %v203_v2  ;;  %v189_v7 = vld [vmem:[%s742_s26 + $0x60] sm:$0xff]  ;;  %v190_v11 = vld [vmem:[%s742_s26 + $0x68] sm:$0xff]  ;;  %v191_v15 = vld [vmem:[%s742_s26 + $0x70] sm:$0xff] }
  0x12   : > { %234 = vmatpush.msra.mxu0 %v202_v3  ;;  %275 = vmatpush.msra.mxu1 %v202_v3  ;;  %v180_v16 = vld [vmem:[%s742_s26 + $0x18] sm:$0xff]  ;;  %v193_v20 = vld [vmem:[%s742_s26 + $0x80] sm:$0xff]  ;;  %v194_v22 = vld [vmem:[%s742_s26 + $0x88] sm:$0xff] }
  0x13   : > { %316 = vmatpush.msra.mxu2 %v202_v3  ;;  %357 = vmatpush.msra.mxu3 %v202_v3  ;;  %v184_v17 = vld [vmem:[%s742_s26 + $0x38] sm:$0xff]  ;;  %v197_v21 = vld [vmem:[%s742_s26 + $0xa0] sm:$0xff]  ;;  %v198_v23 = vld [vmem:[%s742_s26 + $0xa8] sm:$0xff] }
  0x14   : > { %647 = vmatmul.msk.f32.vlgmr.msra.gmra.mxu0 %vm206_vm0, %v177_v4  ;;  %651 = vmatmul.msk.f32.vlgmr.msra.gmra.mxu1 %vm206_vm0, %v181_v5  ;;  %v188_v18 = vld [vmem:[%s742_s26 + $0x58] sm:$0xff]  ;;  %v195_v24 = vld [vmem:[%s742_s26 + $0x90] sm:$0xff] }
  0x15   : > { %655 = vmatmul.msk.f32.vlgmr.msra.gmra.mxu2 %vm206_vm0, %v185_v6  ;;  %659 = vmatmul.msk.f32.vlgmr.msra.gmra.mxu3 %vm206_vm0, %v189_v7  ;;  %v192_v19 = vld [vmem:[%s742_s26 + $0x78] sm:$0xff]  ;;  %v199_v25 = vld [vmem:[%s742_s26 + $0xb0] sm:$0xff] }
  0x16   : > { %395 = vmatpush.msrb.mxu0 %v205_v0  ;;  %436 = vmatpush.msrb.mxu1 %v205_v0  ;;  %v196_v26 = vld [vmem:[%s742_s26 + $0x98] sm:$0xff] }
  0x17   : > { %v200_v27 = vld [vmem:[%s742_s26 + $0xb8] sm:$0xff] }
  0x18   : > { %396 = vmatpush.msrb.mxu0 %v204_v1  ;;  %437 = vmatpush.msrb.mxu1 %v204_v1 }
  0x1a   : > { %397 = vmatpush.msrb.mxu0 %v203_v2  ;;  %438 = vmatpush.msrb.mxu1 %v203_v2 }
  0x1c   : > { %648 = vmatmul.msk.f32.gmra.mxu0 %vm206_vm0, %v178_v8  ;;  %652 = vmatmul.msk.f32.gmra.mxu1 %vm206_vm0, %v182_v9 }
  0x1d   : > { %656 = vmatmul.msk.f32.gmra.mxu2 %vm206_vm0, %v186_v10  ;;  %660 = vmatmul.msk.f32.gmra.mxu3 %vm206_vm0, %v190_v11 }
  0x1e   : > { %398 = vmatpush.msrb.mxu0 %v202_v3  ;;  %439 = vmatpush.msrb.mxu1 %v202_v3 }
  0x24   : > { %649 = vmatmul.msk.f32.gmra.mxu0 %vm206_vm0, %v179_v12  ;;  %653 = vmatmul.msk.f32.gmra.mxu1 %vm206_vm0, %v183_v13 }
  0x25   : > { %657 = vmatmul.msk.f32.gmra.mxu2 %vm206_vm0, %v187_v14  ;;  %661 = vmatmul.msk.f32.gmra.mxu3 %vm206_vm0, %v191_v15 }
  0x2c   : > { %650 = vmatmul.msk.f32.gmra.mxu0 %vm206_vm0, %v180_v16  ;;  %654 = vmatmul.msk.f32.gmra.mxu1 %vm206_vm0, %v184_v17 }
  0x2d   : > { %658 = vmatmul.msk.f32.gmra.mxu2 %vm206_vm0, %v188_v18  ;;  %662 = vmatmul.msk.f32.gmra.mxu3 %vm206_vm0, %v192_v19 }
  0x34   : > { %663 = vmatmul.msk.f32.vlgmr.msrb.gmra.mxu0 %vm206_vm0, %v193_v20  ;;  %667 = vmatmul.msk.f32.vlgmr.msrb.gmra.mxu1 %vm206_vm0, %v197_v21 }
  0x3c   : > { %664 = vmatmul.msk.f32.gmra.mxu0 %vm206_vm0, %v194_v22  ;;  %668 = vmatmul.msk.f32.gmra.mxu1 %vm206_vm0, %v198_v23 }
  0x44   : > { %665 = vmatmul.msk.f32.gmra.mxu0 %vm206_vm0, %v195_v24  ;;  %669 = vmatmul.msk.f32.gmra.mxu1 %vm206_vm0, %v199_v25 }
  0x4c   : > { %666 = vmatmul.msk.f32.gmra.mxu0 %vm206_vm0, %v196_v26  ;;  %670 = vmatmul.msk.f32.gmra.mxu1 %vm206_vm0, %v200_v27 }
  0x91   : > { %v236_v28 = vpop.f32.mrf.mxu0  ;;  %v277_v29 = vpop.f32.mrf.mxu1 }
  0x98   : > { %v318_v30 = vpop.f32.mrf.mxu2  ;;  %v359_v31 = vpop.f32.mrf.mxu3 }
  0x99   : > { %v239_v32 = vpop.f32.mrf.mxu0  ;;  %v280_v33 = vpop.f32.mrf.mxu1 }
  0xa0   : > { %v321_v34 = vpop.f32.mrf.mxu2  ;;  %v362_v35 = vpop.f32.mrf.mxu3 }
  0xa1   : > { %v242_v36 = vpop.f32.mrf.mxu0  ;;  %v283_v37 = vpop.f32.mrf.mxu1 }
  0xa8   : > { %v324_v38 = vpop.f32.mrf.mxu2  ;;  %v365_v39 = vpop.f32.mrf.mxu3 }
  0xa9   : > { %v245_v40 = vpop.f32.mrf.mxu0  ;;  %v286_v41 = vpop.f32.mrf.mxu1 }
  0xaa   : > { %468 = vmatpush.msrb.mxu2 %v245_v40  ;;  %488 = vmatpush.msrb.mxu3 %v286_v41 }
  0xac   : > { %469 = vmatpush.msrb.mxu2 %v242_v36  ;;  %489 = vmatpush.msrb.mxu3 %v283_v37 }
  0xae   : > { %470 = vmatpush.msrb.mxu2 %v239_v32  ;;  %490 = vmatpush.msrb.mxu3 %v280_v33 }
  0xb0   : > { %v327_v43 = vpop.f32.mrf.mxu2  ;;  %v368_v44 = vpop.f32.mrf.mxu3  ;;  %471 = vmatpush.msrb.mxu2 %v236_v28  ;;  %491 = vmatpush.msrb.mxu3 %v277_v29 }
  0xb1   : > { %v400_v45 = vpop.f32.mrf.mxu0  ;;  %v441_v46 = vpop.f32.mrf.mxu1  ;;  %671 = vmatmul.msk.f32.vlgmr.msrb.gmra.mxu2 %vm206_vm0, %v201_v42  ;;  %672 = vmatmul.msk.f32.vlgmr.msrb.gmra.mxu3 %vm206_vm0, %v201_v42 }
  0xb2   : > { %508 = vmatpush.msra.mxu2 %v327_v43  ;;  %528 = vmatpush.msra.mxu3 %v368_v44 }
  0xb4   : > { %509 = vmatpush.msra.mxu2 %v324_v38  ;;  %529 = vmatpush.msra.mxu3 %v365_v39 }
  0xb6   : > { %510 = vmatpush.msra.mxu2 %v321_v34  ;;  %530 = vmatpush.msra.mxu3 %v362_v35 }
  0xb8   : > { %511 = vmatpush.msra.mxu2 %v318_v30  ;;  %531 = vmatpush.msra.mxu3 %v359_v31 }
  0xb9   : > { %v403_v47 = vpop.f32.mrf.mxu0  ;;  %v444_v48 = vpop.f32.mrf.mxu1  ;;  %673 = vmatmul.msk.f32.vlgmr.msra.gmra.mxu2 %vm206_vm0, %v201_v42  ;;  %674 = vmatmul.msk.f32.vlgmr.msra.gmra.mxu3 %vm206_vm0, %v201_v42 }
  0xc1   : > { %v406_v49 = vpop.f32.mrf.mxu0  ;;  %v447_v50 = vpop.f32.mrf.mxu1 }
  0xc9   : > { %v409_v51 = vpop.f32.mrf.mxu0  ;;  %v450_v52 = vpop.f32.mrf.mxu1 }
  0xca   : > { %548 = vmatpush.msrb.mxu2 %v409_v51  ;;  %568 = vmatpush.msrb.mxu3 %v450_v52 }
  0xcc   : > { %549 = vmatpush.msrb.mxu2 %v406_v49  ;;  %569 = vmatpush.msrb.mxu3 %v447_v50 }
  0xce   : > { %550 = vmatpush.msrb.mxu2 %v403_v47  ;;  %570 = vmatpush.msrb.mxu3 %v444_v48 }
  0xd0   : > { %551 = vmatpush.msrb.mxu2 %v400_v45  ;;  %571 = vmatpush.msrb.mxu3 %v441_v46 }
  0xd1   : > { %675 = vmatmul.msk.f32.vlgmr.msrb.gmra.mxu2 %vm206_vm0, %v201_v42  ;;  %676 = vmatmul.msk.f32.vlgmr.msrb.gmra.mxu3 %vm206_vm0, %v201_v42 }
 0x134   : > { %v473_v53 = vpop.f32.mrf.mxu2  ;;  %v493_v54 = vpop.f32.mrf.mxu3 }
 0x135   : > { %577 = vst.msk [vmem:[%s175_s5] sm:$0xf] %vm576_vm1, %v473_v53 }
 0x136   : > { %578 = vst.msk [vmem:[%s175_s5 + $0x4] sm:$0xf] %vm576_vm1, %v493_v54 }
 0x13c   : > { %v513_v55 = vpop.f32.mrf.mxu2  ;;  %v533_v56 = vpop.f32.mrf.mxu3 }
 0x13d   : > { %579 = vst.msk [vmem:[%s175_s5 + $0x8] sm:$0xf] %vm576_vm1, %v513_v55 }
 0x13e   : > { %580 = vst.msk [vmem:[%s175_s5 + $0xc] sm:$0xf] %vm576_vm1, %v533_v56 }
 0x154   : > { %v553_v57 = vpop.f32.mrf.mxu2  ;;  %v573_v58 = vpop.f32.mrf.mxu3 }
 0x155   : > { %581 = vst.msk [vmem:[%s175_s5 + $0x10] sm:$0xf] %vm576_vm1, %v553_v57 }
 0x156   : > { %582 = vst.msk [vmem:[%s175_s5 + $0x14] sm:$0xf] %vm576_vm1, %v573_v58 }
 0x157 PF: > { %s13_s12 = sadd.s32 1, %s694_s12  }
 0x158   : > { %p10_p4 = scmp.ge.s32.totalorder %s13_s12, 4  }
 0x15a   :  { %12 = sbr.rel (!%p10_p4) target bundleno = 1 (0x1), region = 62 }

// kernel: squeeze.4
= control target key start
LH: loop header
LB: loop body
LE: loop exit
PB: predicated region body
PF: predicated region fallthrough
CT: control target
= control target key end

     0   :  { %s37_s8 = smov 80   ;;  %s38_s9 = smov 96   ;;  %vm7_vm0 = vcmask 130048   ;;  %s55_s0 = inlined_call_operand.vmem [shape: f32[64], index: 0, kind: input, shape index: {}]   ;;  %s56_s1 = inlined_call_operand.vmem [shape: f32[4,16], index: 1, kind: output, shape index: {}]  }
   0x1   :  { %v4_v0 = vld [vmem:[%s55_s0] sm:$0x1]  ;;  %s36_s0 = smov 112  }
   0x2   :  { %5 = vst [vmem:[#allocation1] sm:$0x1] %v4_v0 }
   0x9   :  { %v9_v1 = vld [vmem:[#allocation1] sm:$0x1]  }
   0xa   :  { %v21_v2 = vld [vmem:[#allocation1] sm:$0x1]   ;;  %10 = vrot.lane.b32.xlu0 %v9_v1, %s36_s0 }
   0xb   :  { %22 = vrot.lane.b32.xlu1 %v21_v2, %s37_s8  ;;  %v15_v3 = vld [vmem:[#allocation1] sm:$0x1]  }
   0xc   :  { %v6_v4 = vld [vmem:[#allocation1] sm:$0x1]  }
   0xd   :  { %8 = vst.msk [vmem:[#allocation0] sm:$0x1] %vm7_vm0, %v6_v4  }
  0x12   :  { %16 = vrot.lane.b32.xlu0 %v15_v3, %s38_s9 }
  0x7c   :  { %v11_v5 = vpop.permute.xlu0 %10  }
  0x7d   :  { %v23_v6 = vpop.permute.xlu1 %22   ;;  %14 = vst.msk [vmem:[#allocation0 + $0x1] sm:$0x1] %vm7_vm0, %v11_v5  }
  0x7e   :  { %26 = vst.msk [vmem:[#allocation0 + $0x3] sm:$0x1] %vm7_vm0, %v23_v6  }
  0x84   :  { %v17_v7 = vpop.permute.xlu0 %16  }
  0x85   :  { %20 = vst.msk [vmem:[#allocation0 + $0x2] sm:$0x1] %vm7_vm0, %v17_v7  }
  0x8c   :  { %v29_v8 = vld [vmem:[#allocation0] sm:$0xf] }
  0x8d   :  { %32 = vst [vmem:[%s56_s1] sm:$0xf] %v29_v8 }

// kernel: squeeze.5
= control target key start
LH: loop header
LB: loop body
LE: loop exit
PB: predicated region body
PF: predicated region fallthrough
CT: control target
= control target key end

     0   :  { %s142_s8 = smov 124   ;;  %s143_s9 = smov 108   ;;  %vm7_vm0 = vcmask 31744   ;;  %s197_s0 = inlined_call_operand.vmem [shape: f32[64], index: 0, kind: input, shape index: {}]   ;;  %s198_s1 = inlined_call_operand.vmem [shape: f32[4,4,4], index: 1, kind: output, shape index: {}]  }
   0x1   :  { %v4_v0 = vld [vmem:[%s197_s0] sm:$0x1]  ;;  %s141_s0 = smov 116   ;;  %s144_s10 = smov 112  }
   0x2   :  { %5 = vst [vmem:[#allocation1] sm:$0x1] %v4_v0  ;;  %s145_s11 = smov 120   ;;  %s146_s12 = smov 104  }
   0x3   :  { %s147_s13 = smov 96   ;;  %s148_s14 = smov 100  }
   0x4   :  { %s149_s15 = smov 92   ;;  %s150_s16 = smov 84  }
   0x5   :  { %s151_s17 = smov 88   ;;  %s152_s18 = smov 80  }
   0x6   :  { %s153_s19 = smov 72   ;;  %s154_s20 = smov 76  }
   0x7   :  { %s155_s21 = smov 68  }
   0x9   :  { %v21_v1 = vld [vmem:[#allocation1] sm:$0x1]  }
   0xa   :  { %v9_v2 = vld [vmem:[#allocation1] sm:$0x1]   ;;  %22 = vrot.lane.b32.xlu1 %v21_v1, %s141_s0 }
   0xb   :  { %10 = vrot.lane.b32.xlu0 %v9_v2, %s142_s8  ;;  %v33_v3 = vld [vmem:[#allocation1] sm:$0x1]  }
   0xc   :  { %34 = vrot.lane.b32.xlu2 %v33_v3, %s143_s9  ;;  %v27_v4 = vld [vmem:[#allocation1] sm:$0x1]  }
   0xd   :  { %v15_v5 = vld [vmem:[#allocation1] sm:$0x1]  }
   0xe   :  { %v39_v6 = vld [vmem:[#allocation1] sm:$0x1]  }
   0xf   :  { %v51_v7 = vld [vmem:[#allocation1] sm:$0x1]  }
  0x10   :  { %v45_v8 = vld [vmem:[#allocation1] sm:$0x1]  }
  0x11   :  { %v57_v9 = vld [vmem:[#allocation1] sm:$0x1]  }
  0x12   :  { %28 = vrot.lane.b32.xlu1 %v27_v4, %s144_s10  ;;  %v69_v10 = vld [vmem:[#allocation1] sm:$0x1]  }
  0x13   :  { %16 = vrot.lane.b32.xlu0 %v15_v5, %s145_s11  ;;  %v63_v11 = vld [vmem:[#allocation1] sm:$0x1]  }
  0x14   :  { %40 = vrot.lane.b32.xlu2 %v39_v6, %s146_s12  ;;  %v75_v12 = vld [vmem:[#allocation1] sm:$0x1]  }
  0x15   :  { %v87_v13 = vld [vmem:[#allocation1] sm:$0x1]  }
  0x16   :  { %v81_v14 = vld [vmem:[#allocation1] sm:$0x1]  }
  0x17   :  { %v93_v15 = vld [vmem:[#allocation1] sm:$0x1]  }
  0x18   :  { %v6_v16 = vld [vmem:[#allocation1] sm:$0x1]  }
  0x19   :  { %8 = vst.msk [vmem:[#allocation0] sm:$0x1] %vm7_vm0, %v6_v16  }
  0x1a   :  { %52 = vrot.lane.b32.xlu1 %v51_v7, %s147_s13 }
  0x1b   :  { %46 = vrot.lane.b32.xlu0 %v45_v8, %s148_s14 }
  0x1c   :  { %58 = vrot.lane.b32.xlu2 %v57_v9, %s149_s15 }
  0x22   :  { %70 = vrot.lane.b32.xlu1 %v69_v10, %s150_s16 }
  0x23   :  { %64 = vrot.lane.b32.xlu0 %v63_v11, %s151_s17 }
  0x24   :  { %76 = vrot.lane.b32.xlu2 %v75_v12, %s152_s18 }
  0x2a   :  { %88 = vrot.lane.b32.xlu1 %v87_v13, %s153_s19 }
  0x2b   :  { %82 = vrot.lane.b32.xlu0 %v81_v14, %s154_s20 }
  0x2c   :  { %94 = vrot.lane.b32.xlu2 %v93_v15, %s155_s21 }
  0x66   :  { %v35_v17 = vpop.permute.xlu2 %34  }
  0x67   :  { %38 = vst.msk [vmem:[#allocation0 + $0x9] sm:$0x1] %vm7_vm0, %v35_v17  }
  0x6e   :  { %v41_v18 = vpop.permute.xlu2 %40  }
  0x6f   :  { %44 = vst.msk [vmem:[#allocation0 + $0xa] sm:$0x1] %vm7_vm0, %v41_v18  }
  0x76   :  { %v59_v19 = vpop.permute.xlu2 %58  }
  0x77   :  { %62 = vst.msk [vmem:[#allocation0 + $0x11] sm:$0x1] %vm7_vm0, %v59_v19  }
  0x7c   :  { %v23_v20 = vpop.permute.xlu1 %22  }
  0x7d   :  { %v11_v21 = vpop.permute.xlu0 %10   ;;  %26 = vst.msk [vmem:[#allocation0 + $0x3] sm:$0x1] %vm7_vm0, %v23_v20  }
  0x7e   :  { %14 = vst.msk [vmem:[#allocation0 + $0x1] sm:$0x1] %vm7_vm0, %v11_v21   ;;  %v77_v22 = vpop.permute.xlu2 %76  }
  0x7f   :  { %80 = vst.msk [vmem:[#allocation0 + $0x18] sm:$0x1] %vm7_vm0, %v77_v22  }
  0x84   :  { %v29_v23 = vpop.permute.xlu1 %28  }
  0x85   :  { %v17_v24 = vpop.permute.xlu0 %16   ;;  %32 = vst.msk [vmem:[#allocation0 + $0x8] sm:$0x1] %vm7_vm0, %v29_v23  }
  0x86   :  { %20 = vst.msk [vmem:[#allocation0 + $0x2] sm:$0x1] %vm7_vm0, %v17_v24   ;;  %v95_v25 = vpop.permute.xlu2 %94  }
  0x87   :  { %98 = vst.msk [vmem:[#allocation0 + $0x1b] sm:$0x1] %vm7_vm0, %v95_v25  }
  0x8c   :  { %v53_v26 = vpop.permute.xlu1 %52  }
  0x8d   :  { %v47_v27 = vpop.permute.xlu0 %46   ;;  %v101_v28 = vld [vmem:[#allocation0] sm:$0xf]  ;;  %56 = vst.msk [vmem:[#allocation0 + $0x10] sm:$0x1] %vm7_vm0, %v53_v26  }
  0x8e   :  { %104 = vst [vmem:[%s198_s1] sm:$0xf] %v101_v28 }
  0x8f   :  { %50 = vst.msk [vmem:[#allocation0 + $0xb] sm:$0x1] %vm7_vm0, %v47_v27  }
  0x94   :  { %v71_v29 = vpop.permute.xlu1 %70  }
  0x95   :  { %v65_v30 = vpop.permute.xlu0 %64   ;;  %74 = vst.msk [vmem:[#allocation0 + $0x13] sm:$0x1] %vm7_vm0, %v71_v29  }
  0x96   :  { %v106_v31 = vld [vmem:[#allocation0 + $0x8] sm:$0xf]  ;;  %68 = vst.msk [vmem:[#allocation0 + $0x12] sm:$0x1] %vm7_vm0, %v65_v30  }
  0x97   :  { %123 = vst [vmem:[%s198_s1 + $0x4] sm:$0xf] %v106_v31 }
  0x9c   :  { %v89_v32 = vpop.permute.xlu1 %88  }
  0x9d   :  { %v83_v33 = vpop.permute.xlu0 %82   ;;  %v112_v34 = vld [vmem:[#allocation0 + $0x10] sm:$0xf]  ;;  %92 = vst.msk [vmem:[#allocation0 + $0x1a] sm:$0x1] %vm7_vm0, %v89_v32  }
  0x9e   :  { %124 = vst [vmem:[%s198_s1 + $0x8] sm:$0xf] %v112_v34 }
  0x9f   :  { %86 = vst.msk [vmem:[#allocation0 + $0x19] sm:$0x1] %vm7_vm0, %v83_v33  }
  0xa6   :  { %v118_v35 = vld [vmem:[#allocation0 + $0x18] sm:$0xf] }
  0xa7   :  { %125 = vst [vmem:[%s198_s1 + $0xc] sm:$0xf] %v118_v35 }

// kernel: ucosda_forward.6
= control target key start
LH: loop header
LB: loop body
LE: loop exit
PB: predicated region body
PF: predicated region fallthrough
CT: control target
= control target key end

     0   :  { %vm42_vm0 = vcmask 125952   ;;  %vm33_vm1 = vcmask 388096   ;;  %vm109_vm10 = vcmask 1041408   ;;  %vm111_vm11 = vcmask 3072   ;;  %s188_s1 = inlined_call_operand.vmem [shape: f32[4,16], index: 1, kind: input, shape index: {}]   ;;  %s189_s4 = inlined_call_operand.vmem [shape: f32[1,16], index: 4, kind: input, shape index: {}]   ;;  %s190_s0 = inlined_call_operand.vmem [shape: f32[4,48], index: 0, kind: input, shape index: {}]   ;;  %s191_s3 = inlined_call_operand.vmem [shape: f32[1,48], index: 3, kind: input, shape index: {}]   ;;  %s192_s2 = inlined_call_operand.vmem [shape: f32[4,16], index: 2, kind: input, shape index: {}]   ;;  %s193_s5 = inlined_call_operand.<no memory space> [shape: f32[1,1], index: 5, kind: input, shape index: {}]   ;;  %s194_s6 = inlined_call_operand.vmem [shape: f32[4,1], index: 6, kind: output, shape index: {}]  }
   0x1   :  { %v37_v0 = vld [vmem:[%s188_s1] sm:$0xf]  ;;  %v11_v11 = vstv %s193_s5 }
   0x2   :  { %v119_v1 = vld [vmem:[%s189_s4] ss:$0 sm:$0xff]  ;;  %12 = vst [vmem:[#allocation2] sm:$0x1] %v11_v11 }
   0x3   :  { %v28_v2 = vld [vmem:[%s190_s0] sm:$0xf]  ;;  %v41_v4 = vmul.f32 %v119_v1, %v37_v0 }
   0x4   :  { %v120_v3 = vld [vmem:[%s191_s3] ss:$0 sm:$0xff] }
   0x5   :  { %v32_v5 = vmul.f32 %v120_v3, %v28_v2  ;;  %v43_v6 = vsel %vm42_vm0, %v41_v4, 0.0  ;;  %v46_v7 = vld [vmem:[%s192_s2] sm:$0xf] }
   0x6   :  { %44 = vadd.xlane.f32.xlu1 %v43_v6  ;;  %v47_v9 = vmul.f32 %v119_v1, %v46_v7 }
   0x7   :  { %v34_v8 = vsel %vm33_vm1, %v32_v5, 0.0 }
   0x8   :  { %35 = vadd.xlane.f32.xlu0 %v34_v8  ;;  %v48_v10 = vsel %vm42_vm0, %v47_v9, 0.0 }
   0x9   :  { %v121_v13 = vld [vmem:[#allocation2] ss:$0 sm:$0xff] }
  0x10   :  { %49 = vadd.xlane.f32.xlu0 %v48_v10 }
  0x79   :  { %v45_v12 = vpop.xlane.xlu1 %44 }
  0x7b   :  { %v36_v14 = vpop.xlane.xlu0 %35 }
  0x7c   :  { %v51_v15 = vadd.f32 %v45_v12, %v36_v14 }
  0x7e   :  { %v55_v16 = vadd.f32 %v121_v13, %v51_v15 }
  0x80   :  { %v117_v17 = vmul.f32 -1.442695, %v55_v16 }
  0x82   :  { %122 = vpow2.f32 %v117_v17 }
  0x83   :  { %v50_v18 = vpop.xlane.xlu0 %49 }
  0x84   :  { %v75_v19 = vadd.f32 %v50_v18, %v36_v14 }
  0x86   :  { %v76_v20 = vadd.f32 %v121_v13, %v75_v19 }
  0x88   :  { %v123_v21 = vpop.eup %122  ;;  %v118_v22 = vmul.f32 -1.442695, %v76_v20 }
  0x89   :  { %v59_v23 = vadd.f32 1.0, %v123_v21 }
  0x8a   :  { %124 = vpow2.f32 %v118_v22 }
  0x8b   :  { %126 = vrcp.f32 %v59_v23  ;;  %v71_v32 = vand.u32 2147483648, %v59_v23  ;;  %vm65_vm3 = vweird.f32 %v59_v23  ;;  %v69_v33 = vand.u32 2147483647, %v59_v23 }
  0x8d   :  { %v72_v37 = vor.u32 1.1754944e-38, %v71_v32  ;;  %vm70_vm5 = vcmp.eq.f32.partialorder %v69_v33, 8.507059e+37 }
  0x90   :  { %v125_v24 = vpop.eup %124 }
  0x91   :  { %v127_v25 = vpop.eup %126  ;;  %v80_v26 = vadd.f32 1.0, %v125_v24 }
  0x92   :  { %v61_v27 = vmul.f32 %v127_v25, %v59_v23  ;;  %vm66_vm2 = vweird.f32 %v127_v25 }
  0x93   :  { %128 = vrcp.f32 %v80_v26  ;;  %vm67_vm4 = vmor %vm65_vm3, %vm66_vm2  ;;  %v92_v38 = vand.u32 2147483648, %v80_v26  ;;  %v90_v40 = vand.u32 2147483647, %v80_v26  ;;  %vm86_vm7 = vweird.f32 %v80_v26 }
  0x94   :  { %v62_v28 = vsub.f32 1.0, %v61_v27 }
  0x95   :  { %v93_v43 = vor.u32 1.1754944e-38, %v92_v38  ;;  %vm91_vm9 = vcmp.eq.f32.partialorder %v90_v40, 8.507059e+37 }
  0x96   :  { %v63_v29 = vmul.f32 %v127_v25, %v62_v28 }
  0x98   :  { %v64_v30 = vadd.f32 %v127_v25, %v63_v29 }
  0x99   :  { %v129_v31 = vpop.eup %128 }
  0x9a   :  { %v82_v34 = vmul.f32 %v129_v31, %v80_v26  ;;  %v68_v35 = vsel %vm67_vm4, %v127_v25, %v64_v30  ;;  %vm87_vm6 = vweird.f32 %v129_v31 }
  0x9b   :  { %v73_v41 = vsel %vm70_vm5, %v72_v37, %v68_v35  ;;  %vm88_vm8 = vmor %vm86_vm7, %vm87_vm6 }
  0x9c   :  { %v83_v36 = vsub.f32 1.0, %v82_v34  ;;  %v97_v44 = vrot.slane %v73_v41, 2 }
  0x9e   :  { %v84_v39 = vmul.f32 %v129_v31, %v83_v36  ;;  %v99_v48 = vadd.f32 %v97_v44, %v73_v41 }
  0xa0   :  { %v85_v42 = vadd.f32 %v129_v31, %v84_v39  ;;  %v100_v51 = vmul.f32 0.5, %v99_v48 }
  0xa2   :  { %v89_v45 = vsel %vm88_vm8, %v129_v31, %v85_v42 }
  0xa3   :  { %v94_v46 = vsel %vm91_vm9, %v93_v43, %v89_v45 }
  0xa4   :  { %v102_v47 = vrot.slane %v94_v46, 2 }
  0xa6   :  { %v104_v49 = vadd.f32 %v102_v47, %v94_v46 }
  0xa8   :  { %v105_v50 = vmul.f32 0.5, %v104_v49 }
  0xaa   :  { %v107_v52 = vrot.slane %v105_v50, 6 }
  0xac   :  { %v110_v53 = vsel %vm109_vm10, %v100_v51, %v107_v52 }
  0xad   :  { %112 = vst.msk [vmem:[%s194_s6] sm:$0xf] %vm111_vm11, %v110_v53 }

// kernel: ucosda_forward.7
= control target key start
LH: loop header
LB: loop body
LE: loop exit
PB: predicated region body
PF: predicated region fallthrough
CT: control target
= control target key end

     0   :  { %s442_s12 = smov 0   ;;  %s498_s0 = inlined_call_operand.vmem [shape: f32[4,4,4], index: 0, kind: input, shape index: {}]   ;;  %s499_s1 = inlined_call_operand.vmem [shape: f32[32,4], index: 1, kind: input, shape index: {}]   ;;  %s500_s2 = inlined_call_operand.vmem [shape: f32[4,32], index: 2, kind: input, shape index: {}]   ;;  %s501_s3 = inlined_call_operand.vmem [shape: f32[4,32,32], index: 3, kind: output, shape index: {}]  }
   0x1 LB: > { %s377_s13 = sadd.s32 4294967295, %s420_s12   ;;  %p381_p0 = scmp.ge.s32.totalorder %s420_s12, 1  ;;  %s420_s12 = sphi %s442_s12, %s13_s12  }
   0x2   : > { %p138_p1 = scmp.lt.s32.totalorder %s420_s12, 3 }
   0x4   : > { %p139_p2 = pnand %p381_p0, %p138_p1 }
   0x5   : > { %s382_s16 = sshll.u32 (!%p139_p2), %s377_s13, 1 }
   0x6   : > { %142 = sbr.rel (%p139_p2) target bundleno = 293 (0x125), region = 32  ;;  %p164_p3 = scmp.lt.s32.totalorder (!%p139_p2), %s382_s16, 3 }
   0xb   : > { %v182_v0 = vld [vmem:[%s500_s2] sm:$0xf]  ;;  %vm187_vm0 = vcmask 1043456   ;;  %s503_s16 = smov (!%p164_p3, %s382_s16), 3  ;;  %vm183_vm1 = vcmask 31744   ;;  %v179_v3 = vld [vmem:[%s499_s1 + $0x8] sm:$0xff] }
   0xc   : > { %387 = vmatpush.msk.msra.mxu0 %vm187_vm0, %v182_v0  ;;  %389 = vmatpush.msk.msra.mxu1 %vm187_vm0, %v182_v0  ;;  %s383_s17 = sshll.u32 %s503_s16, 2  ;;  %v178_v6 = vld [vmem:[%s499_s1] sm:$0xff]  ;;  %v180_v7 = vld [vmem:[%s499_s1 + $0x10] sm:$0xff]  ;;  %v181_v8 = vld [vmem:[%s499_s1 + $0x18] sm:$0xff]  ;;  %s403_s29 = sshll.u32 %s503_s16, 5  ;;  %vm310_vm2 = vcmask 261120  }
   0xd   : > { %s167_s20 = scalar_lea.vmem %s498_s0, %s383_s17  ;;  %s174_s5 = scalar_lea.vmem %s501_s3, %s403_s29 }
   0xe   : > { %v176_v1 = vld [vmem:[%s167_s20] sm:$0xf]  ;;  %v177_v2 = vld [vmem:[%s167_s20 + $0x4] sm:$0xf] }
   0xf   : > { %388 = vmatmul.msk.f32.vlgmr.msra.gmra.mxu0 %vm183_vm1, %v176_v1  ;;  %390 = vmatmul.msk.f32.vlgmr.msra.gmra.mxu1 %vm183_vm1, %v177_v2 }
  0x8c   : > { %v208_v4 = vpop.f32.mrf.mxu0  ;;  %v231_v5 = vpop.f32.mrf.mxu1 }
  0x8d   : > { %391 = vmatpush.msk.msrb.mxu0 %vm187_vm0, %v208_v4  ;;  %404 = vmatpush.msk.msra.mxu2 %vm187_vm0, %v208_v4 }
  0x8e   : > { %393 = vmatmul.msk.f32.vlgmr.msra.gmra.mxu2 %vm183_vm1, %v179_v3  ;;  %396 = vmatpush.msk.msrb.mxu1 %vm187_vm0, %v231_v5 }
  0x8f   : > { %405 = vmatpush.msk.msra.mxu3 %vm187_vm0, %v231_v5  ;;  %392 = vmatmul.msk.f32.vlgmr.msrb.gmra.mxu0 %vm183_vm1, %v178_v6 }
  0x90   : > { %398 = vmatmul.msk.f32.vlgmr.msra.gmra.mxu3 %vm183_vm1, %v179_v3  ;;  %397 = vmatmul.msk.f32.vlgmr.msrb.gmra.mxu1 %vm183_vm1, %v178_v6 }
  0x96   : > { %394 = vmatmul.msk.f32.gmra.mxu2 %vm183_vm1, %v180_v7 }
  0x98   : > { %399 = vmatmul.msk.f32.gmra.mxu3 %vm183_vm1, %v180_v7 }
  0x9e   : > { %395 = vmatmul.msk.f32.gmra.mxu2 %vm183_vm1, %v181_v8 }
  0xa0   : > { %400 = vmatmul.msk.f32.gmra.mxu3 %vm183_vm1, %v181_v8 }
 0x10c   : > { %v266_v9 = vpop.f32.mrf.mxu0 }
 0x10d   : > { %311 = vst.msk [vmem:[%s174_s5] sm:$0xff] %vm310_vm2, %v266_v9  ;;  %v298_v10 = vpop.f32.mrf.mxu1 }
 0x10e   : > { %315 = vst.msk [vmem:[%s174_s5 + $0x20] sm:$0xff] %vm310_vm2, %v298_v10 }
 0x111   : > { %v269_v11 = vpop.f32.mrf.mxu2 }
 0x112   : > { %312 = vst.msk [vmem:[%s174_s5 + $0x8] sm:$0xff] %vm310_vm2, %v269_v11 }
 0x113   : > { %v301_v12 = vpop.f32.mrf.mxu3 }
 0x114   : > { %316 = vst.msk [vmem:[%s174_s5 + $0x28] sm:$0xff] %vm310_vm2, %v301_v12 }
 0x119   : > { %v272_v13 = vpop.f32.mrf.mxu2 }
 0x11a   : > { %313 = vst.msk [vmem:[%s174_s5 + $0x10] sm:$0xff] %vm310_vm2, %v272_v13 }
 0x11b   : > { %v304_v14 = vpop.f32.mrf.mxu3 }
 0x11c   : > { %317 = vst.msk [vmem:[%s174_s5 + $0x30] sm:$0xff] %vm310_vm2, %v304_v14 }
 0x121   : > { %v275_v15 = vpop.f32.mrf.mxu2 }
 0x122   : > { %314 = vst.msk [vmem:[%s174_s5 + $0x18] sm:$0xff] %vm310_vm2, %v275_v15 }
 0x123   : > { %v307_v16 = vpop.f32.mrf.mxu3 }
 0x124   : > { %318 = vst.msk [vmem:[%s174_s5 + $0x38] sm:$0xff] %vm310_vm2, %v307_v16 }
 0x125 PF: > { %s13_s12 = sadd.s32 1, %s420_s12  }
 0x126   : > { %p10_p4 = scmp.ge.s32.totalorder %s13_s12, 4  }
 0x128   :  { %12 = sbr.rel (!%p10_p4) target bundleno = 1 (0x1), region = 62 }

// kernel: ucosda_forward.4
= control target key start
LH: loop header
LB: loop body
LE: loop exit
PB: predicated region body
PF: predicated region fallthrough
CT: control target
= control target key end

     0   :  { %vm235_vm0 = vcmask 523264   ;;  %vm1301_vm5 = vcmask 1040384   ;;  %vm1303_vm6 = vcmask 1041408   ;;  %vm1305_vm7 = vcmask 518144   ;;  %s2546_s0 = inlined_call_operand.vmem [shape: f32[192,64], index: 0, kind: input, shape index: {}]   ;;  %s2547_s1 = inlined_call_operand.vmem [shape: f32[768,192], index: 1, kind: input, shape index: {}]   ;;  %s2548_s2 = inlined_call_operand.vmem [shape: f32[1,768], index: 2, kind: input, shape index: {}]   ;;  %s2549_s3 = inlined_call_operand.<no memory space> [shape: f32[1,1], index: 3, kind: input, shape index: {}]   ;;  %s2550_s4 = inlined_call_operand.vmem [shape: f32[3,64], index: 4, kind: output, shape index: {}]  }
   0x1   :  { %v226_v0 = vld [vmem:[%s2546_s0 + $0x78] sm:$0xff]  ;;  %v225_v2 = vld [vmem:[%s2546_s0 + $0x70] sm:$0xff]  ;;  %v224_v4 = vld [vmem:[%s2546_s0 + $0x68] sm:$0xff] }
   0x2   :  { %v234_v1 = vld [vmem:[%s2546_s0 + $0xb8] sm:$0xff]  ;;  %524 = vmatpush.msra.mxu0 %v226_v0  ;;  %v233_v3 = vld [vmem:[%s2546_s0 + $0xb0] sm:$0xff]  ;;  %v232_v5 = vld [vmem:[%s2546_s0 + $0xa8] sm:$0xff]  ;;  %1408 = vmatpush.msra.mxu2 %v226_v0 }
   0x3   :  { %837 = vmatpush.msra.mxu1 %v234_v1  ;;  %1424 = vmatpush.msra.mxu3 %v234_v1  ;;  %v223_v6 = vld [vmem:[%s2546_s0 + $0x60] sm:$0xff]  ;;  %v222_v8 = vld [vmem:[%s2546_s0 + $0x58] sm:$0xff]  ;;  %v221_v10 = vld [vmem:[%s2546_s0 + $0x50] sm:$0xff] }
   0x4   :  { %525 = vmatpush.msra.mxu0 %v225_v2  ;;  %v231_v7 = vld [vmem:[%s2546_s0 + $0xa0] sm:$0xff]  ;;  %1409 = vmatpush.msra.mxu2 %v225_v2  ;;  %v230_v9 = vld [vmem:[%s2546_s0 + $0x98] sm:$0xff]  ;;  %v229_v11 = vld [vmem:[%s2546_s0 + $0x90] sm:$0xff] }
   0x5   :  { %838 = vmatpush.msra.mxu1 %v233_v3  ;;  %1425 = vmatpush.msra.mxu3 %v233_v3  ;;  %v220_v12 = vld [vmem:[%s2546_s0 + $0x48] sm:$0xff]  ;;  %v219_v14 = vld [vmem:[%s2546_s0 + $0x40] sm:$0xff]  ;;  %v218_v17 = vld [vmem:[%s2546_s0 + $0x38] sm:$0xff] }
   0x6   :  { %526 = vmatpush.msra.mxu0 %v224_v4  ;;  %1410 = vmatpush.msra.mxu2 %v224_v4  ;;  %v228_v13 = vld [vmem:[%s2546_s0 + $0x88] sm:$0xff]  ;;  %v227_v15 = vld [vmem:[%s2546_s0 + $0x80] sm:$0xff]  ;;  %v217_v18 = vld [vmem:[%s2546_s0 + $0x30] sm:$0xff] }
   0x7   :  { %839 = vmatpush.msra.mxu1 %v232_v5  ;;  %1426 = vmatpush.msra.mxu3 %v232_v5  ;;  %v20_v16 = vld [vmem:[%s2547_s1 + $0x8] sm:$0xff]  ;;  %v215_v20 = vld [vmem:[%s2546_s0 + $0x20] sm:$0xff]  ;;  %v22_v21 = vld [vmem:[%s2547_s1 + $0x18] sm:$0xff] }
   0x8   :  { %527 = vmatpush.msra.mxu0 %v223_v6  ;;  %1411 = vmatpush.msra.mxu2 %v223_v6  ;;  %v216_v19 = vld [vmem:[%s2546_s0 + $0x28] sm:$0xff]  ;;  %v214_v22 = vld [vmem:[%s2546_s0 + $0x18] sm:$0xff]  ;;  %v213_v23 = vld [vmem:[%s2546_s0 + $0x10] sm:$0xff] }
   0x9   :  { %840 = vmatpush.msra.mxu1 %v231_v7  ;;  %1427 = vmatpush.msra.mxu3 %v231_v7  ;;  %v212_v24 = vld [vmem:[%s2546_s0 + $0x8] sm:$0xff]  ;;  %v211_v25 = vld [vmem:[%s2546_s0] sm:$0xff]  ;;  %v21_v28 = vld [vmem:[%s2547_s1 + $0x10] sm:$0xff] }
   0xa   :  { %528 = vmatpush.msra.mxu0 %v222_v8  ;;  %1412 = vmatpush.msra.mxu2 %v222_v8  ;;  %v19_v26 = vld [vmem:[%s2547_s1] sm:$0xff]  ;;  %v24_v27 = vld [vmem:[%s2547_s1 + $0x28] sm:$0xff]  ;;  %v26_v29 = vld [vmem:[%s2547_s1 + $0x38] sm:$0xff] }
   0xb   :  { %841 = vmatpush.msra.mxu1 %v230_v9  ;;  %1428 = vmatpush.msra.mxu3 %v230_v9  ;;  %v23_v30 = vld [vmem:[%s2547_s1 + $0x20] sm:$0xff]  ;;  %v28_v31 = vld [vmem:[%s2547_s1 + $0x48] sm:$0xff]  ;;  %v25_v32 = vld [vmem:[%s2547_s1 + $0x30] sm:$0xff] }
   0xc   :  { %529 = vmatpush.msra.mxu0 %v221_v10  ;;  %1413 = vmatpush.msra.mxu2 %v221_v10  ;;  %v30_v33 = vld [vmem:[%s2547_s1 + $0x58] sm:$0xff]  ;;  %v27_v34 = vld [vmem:[%s2547_s1 + $0x40] sm:$0xff]  ;;  %v32_v35 = vld [vmem:[%s2547_s1 + $0x68] sm:$0xff] }
   0xd   :  { %842 = vmatpush.msra.mxu1 %v229_v11  ;;  %1429 = vmatpush.msra.mxu3 %v229_v11  ;;  %v123_v36 = vld [vmem:[%s2547_s1 + $0x340] sm:$0xff]  ;;  %v29_v37 = vld [vmem:[%s2547_s1 + $0x50] sm:$0xff]  ;;  %v34_v38 = vld [vmem:[%s2547_s1 + $0x78] sm:$0xff] }
   0xe   :  { %530 = vmatpush.msra.mxu0 %v220_v12  ;;  %1414 = vmatpush.msra.mxu2 %v220_v12  ;;  %v125_v39 = vld [vmem:[%s2547_s1 + $0x350] sm:$0xff]  ;;  %v31_v40 = vld [vmem:[%s2547_s1 + $0x60] sm:$0xff]  ;;  %v36_v41 = vld [vmem:[%s2547_s1 + $0x88] sm:$0xff] }
   0xf   :  { %843 = vmatpush.msra.mxu1 %v228_v13  ;;  %1430 = vmatpush.msra.mxu3 %v228_v13  ;;  %v127_v42 = vld [vmem:[%s2547_s1 + $0x360] sm:$0xff]  ;;  %v128_v43 = vld [vmem:[%s2547_s1 + $0x368] sm:$0xff]  ;;  %v33_v44 = vld [vmem:[%s2547_s1 + $0x70] sm:$0xff] }
  0x10   :  { %531 = vmatpush.msra.mxu0 %v219_v14  ;;  %1415 = vmatpush.msra.mxu2 %v219_v14  ;;  %v38_v45 = vld [vmem:[%s2547_s1 + $0x98] sm:$0xff]  ;;  %v129_v46 = vld [vmem:[%s2547_s1 + $0x370] sm:$0xff]  ;;  %v35_v48 = vld [vmem:[%s2547_s1 + $0x80] sm:$0xff] }
  0x11   :  { %844 = vmatpush.msra.mxu1 %v227_v15  ;;  %1431 = vmatpush.msra.mxu3 %v227_v15  ;;  %v130_v47 = vld [vmem:[%s2547_s1 + $0x378] sm:$0xff]  ;;  %v40_v49 = vld [vmem:[%s2547_s1 + $0xa8] sm:$0xff]  ;;  %v131_v50 = vld [vmem:[%s2547_s1 + $0x380] sm:$0xff] }
  0x12   :  { %1311 = vmatmul.msk.f32.vlgmr.msra.gmra.mxu1 %vm235_vm0, %v20_v16  ;;  %532 = vmatpush.msra.mxu0 %v218_v17  ;;  %v132_v51 = vld [vmem:[%s2547_s1 + $0x388] sm:$0xff]  ;;  %v37_v52 = vld [vmem:[%s2547_s1 + $0x90] sm:$0xff]  ;;  %v42_v53 = vld [vmem:[%s2547_s1 + $0xb8] sm:$0xff] }
  0x13   :  { %1416 = vmatpush.msra.mxu2 %v218_v17  ;;  %1365 = vmatmul.msk.f32.vlgmr.msra.gmra.mxu3 %vm235_vm0, %v128_v43  ;;  %v133_v54 = vld [vmem:[%s2547_s1 + $0x390] sm:$0xff]  ;;  %v134_v55 = vld [vmem:[%s2547_s1 + $0x398] sm:$0xff]  ;;  %v39_v56 = vld [vmem:[%s2547_s1 + $0xa0] sm:$0xff] }
  0x14   :  { %533 = vmatpush.msra.mxu0 %v217_v18  ;;  %v44_v57 = vld [vmem:[%s2547_s1 + $0xc8] sm:$0xff]  ;;  %v135_v58 = vld [vmem:[%s2547_s1 + $0x3a0] sm:$0xff]  ;;  %v41_v60 = vld [vmem:[%s2547_s1 + $0xb0] sm:$0xff] }
  0x15   :  { %1417 = vmatpush.msra.mxu2 %v217_v18  ;;  %v136_v59 = vld [vmem:[%s2547_s1 + $0x3a8] sm:$0xff]  ;;  %v46_v61 = vld [vmem:[%s2547_s1 + $0xd8] sm:$0xff]  ;;  %v137_v62 = vld [vmem:[%s2547_s1 + $0x3b0] sm:$0xff] }
  0x16   :  { %534 = vmatpush.msra.mxu0 %v216_v19  ;;  %v138_v63 = vld [vmem:[%s2547_s1 + $0x3b8] sm:$0xff]  ;;  %v43_v0 = vld [vmem:[%s2547_s1 + $0xc0] sm:$0xff]  ;;  %v48_v1 = vld [vmem:[%s2547_s1 + $0xe8] sm:$0xff] }
  0x17   :  { %1418 = vmatpush.msra.mxu2 %v216_v19  ;;  %v139_v2 = vld [vmem:[%s2547_s1 + $0x3c0] sm:$0xff]  ;;  %v140_v3 = vld [vmem:[%s2547_s1 + $0x3c8] sm:$0xff]  ;;  %v45_v4 = vld [vmem:[%s2547_s1 + $0xd0] sm:$0xff] }
  0x18   :  { %535 = vmatpush.msra.mxu0 %v215_v20  ;;  %v50_v5 = vld [vmem:[%s2547_s1 + $0xf8] sm:$0xff]  ;;  %v141_v6 = vld [vmem:[%s2547_s1 + $0x3d0] sm:$0xff]  ;;  %v47_v9 = vld [vmem:[%s2547_s1 + $0xe0] sm:$0xff] }
  0x19   :  { %1419 = vmatpush.msra.mxu2 %v215_v20  ;;  %v142_v7 = vld [vmem:[%s2547_s1 + $0x3d8] sm:$0xff]  ;;  %v52_v10 = vld [vmem:[%s2547_s1 + $0x108] sm:$0xff]  ;;  %v143_v11 = vld [vmem:[%s2547_s1 + $0x3e0] sm:$0xff] }
  0x1a   :  { %1312 = vmatmul.msk.f32.gmra.mxu1 %vm235_vm0, %v22_v21  ;;  %536 = vmatpush.msra.mxu0 %v214_v22  ;;  %v144_v12 = vld [vmem:[%s2547_s1 + $0x3e8] sm:$0xff]  ;;  %v49_v14 = vld [vmem:[%s2547_s1 + $0xf0] sm:$0xff]  ;;  %v54_v15 = vld [vmem:[%s2547_s1 + $0x118] sm:$0xff] }
  0x1b   :  { %1420 = vmatpush.msra.mxu2 %v214_v22  ;;  %1366 = vmatmul.msk.f32.gmra.mxu3 %vm235_vm0, %v130_v47  ;;  %v145_v16 = vld [vmem:[%s2547_s1 + $0x3f0] sm:$0xff]  ;;  %v146_v17 = vld [vmem:[%s2547_s1 + $0x3f8] sm:$0xff]  ;;  %v51_v20 = vld [vmem:[%s2547_s1 + $0x100] sm:$0xff] }
  0x1c   :  { %537 = vmatpush.msra.mxu0 %v213_v23  ;;  %v56_v21 = vld [vmem:[%s2547_s1 + $0x128] sm:$0xff]  ;;  %v147_v22 = vld [vmem:[%s2547_s1 + $0x400] sm:$0xff] }
  0x1d   :  { %1421 = vmatpush.msra.mxu2 %v213_v23  ;;  %v148_v23 = vld [vmem:[%s2547_s1 + $0x408] sm:$0xff] }
  0x1e   :  { %538 = vmatpush.msra.mxu0 %v212_v24  ;;  %v156_v47 = vld [vmem:[%s2547_s1 + $0x448] sm:$0xff] }
  0x1f   :  { %1422 = vmatpush.msra.mxu2 %v212_v24 }
  0x20   :  { %539 = vmatpush.msra.mxu0 %v211_v25 }
  0x21   :  { %540 = vmatmul.f32.vlgmr.msra.gmra.mxu0 %v19_v26  ;;  %1423 = vmatpush.msra.mxu2 %v211_v25  ;;  %v53_v26 = vld [vmem:[%s2547_s1 + $0x110] sm:$0xff] }
  0x22   :  { %1313 = vmatmul.msk.f32.gmra.mxu1 %vm235_vm0, %v24_v27  ;;  %696 = vmatmul.f32.vlgmr.msra.gmra.mxu2 %v123_v36  ;;  %v58_v27 = vld [vmem:[%s2547_s1 + $0x138] sm:$0xff] }
  0x23   :  { %1367 = vmatmul.msk.f32.gmra.mxu3 %vm235_vm0, %v132_v51  ;;  %v66_v51 = vld [vmem:[%s2547_s1 + $0x178] sm:$0xff] }
  0x29   :  { %543 = vmatmul.f32.gmra.mxu0 %v21_v28  ;;  %v149_v28 = vld [vmem:[%s2547_s1 + $0x410] sm:$0xff] }
  0x2a   :  { %1314 = vmatmul.msk.f32.gmra.mxu1 %vm235_vm0, %v26_v29  ;;  %699 = vmatmul.f32.gmra.mxu2 %v125_v39  ;;  %v150_v29 = vld [vmem:[%s2547_s1 + $0x418] sm:$0xff] }
  0x2b   :  { %1368 = vmatmul.msk.f32.gmra.mxu3 %vm235_vm0, %v134_v55  ;;  %v62_v39 = vld [vmem:[%s2547_s1 + $0x158] sm:$0xff] }
  0x31   :  { %546 = vmatmul.f32.gmra.mxu0 %v23_v30 }
  0x32   :  { %1315 = vmatmul.msk.f32.gmra.mxu1 %vm235_vm0, %v28_v31  ;;  %702 = vmatmul.f32.gmra.mxu2 %v127_v42 }
  0x33   :  { %1369 = vmatmul.msk.f32.gmra.mxu3 %vm235_vm0, %v136_v59 }
  0x39   :  { %549 = vmatmul.f32.gmra.mxu0 %v25_v32  ;;  %v55_v32 = vld [vmem:[%s2547_s1 + $0x120] sm:$0xff] }
  0x3a   :  { %1316 = vmatmul.msk.f32.gmra.mxu1 %vm235_vm0, %v30_v33  ;;  %705 = vmatmul.f32.gmra.mxu2 %v129_v46  ;;  %v60_v33 = vld [vmem:[%s2547_s1 + $0x148] sm:$0xff]  ;;  %v155_v46 = vld [vmem:[%s2547_s1 + $0x440] sm:$0xff] }
  0x3b   :  { %1370 = vmatmul.msk.f32.gmra.mxu3 %vm235_vm0, %v138_v63 }
  0x41   :  { %552 = vmatmul.f32.gmra.mxu0 %v27_v34  ;;  %v151_v34 = vld [vmem:[%s2547_s1 + $0x420] sm:$0xff] }
  0x42   :  { %1317 = vmatmul.msk.f32.gmra.mxu1 %vm235_vm0, %v32_v35  ;;  %708 = vmatmul.f32.gmra.mxu2 %v131_v50  ;;  %v152_v35 = vld [vmem:[%s2547_s1 + $0x428] sm:$0xff]  ;;  %v61_v50 = vld [vmem:[%s2547_s1 + $0x150] sm:$0xff] }
  0x43   :  { %1371 = vmatmul.msk.f32.gmra.mxu3 %vm235_vm0, %v140_v3 }
  0x49   :  { %555 = vmatmul.f32.gmra.mxu0 %v29_v37 }
  0x4a   :  { %1318 = vmatmul.msk.f32.gmra.mxu1 %vm235_vm0, %v34_v38  ;;  %711 = vmatmul.f32.gmra.mxu2 %v133_v54  ;;  %v57_v38 = vld [vmem:[%s2547_s1 + $0x130] sm:$0xff]  ;;  %v158_v54 = vld [vmem:[%s2547_s1 + $0x458] sm:$0xff] }
  0x4b   :  { %1372 = vmatmul.msk.f32.gmra.mxu3 %vm235_vm0, %v142_v7 }
  0x51   :  { %558 = vmatmul.f32.gmra.mxu0 %v31_v40  ;;  %v153_v40 = vld [vmem:[%s2547_s1 + $0x430] sm:$0xff] }
  0x52   :  { %1319 = vmatmul.msk.f32.gmra.mxu1 %vm235_vm0, %v36_v41  ;;  %714 = vmatmul.f32.gmra.mxu2 %v135_v58  ;;  %v154_v41 = vld [vmem:[%s2547_s1 + $0x438] sm:$0xff]  ;;  %v68_v58 = vld [vmem:[%s2547_s1 + $0x188] sm:$0xff] }
  0x53   :  { %1373 = vmatmul.msk.f32.gmra.mxu3 %vm235_vm0, %v144_v12 }
  0x59   :  { %561 = vmatmul.f32.gmra.mxu0 %v33_v44  ;;  %v59_v44 = vld [vmem:[%s2547_s1 + $0x140] sm:$0xff] }
  0x5a   :  { %1320 = vmatmul.msk.f32.gmra.mxu1 %vm235_vm0, %v38_v45  ;;  %717 = vmatmul.f32.gmra.mxu2 %v137_v62  ;;  %v64_v45 = vld [vmem:[%s2547_s1 + $0x168] sm:$0xff] }
  0x5b   :  { %1374 = vmatmul.msk.f32.gmra.mxu3 %vm235_vm0, %v146_v17  ;;  %v163_v17 = vld [vmem:[%s2547_s1 + $0x480] sm:$0xff] }
  0x61   :  { %564 = vmatmul.f32.gmra.mxu0 %v35_v48 }
  0x62   :  { %1321 = vmatmul.msk.f32.gmra.mxu1 %vm235_vm0, %v40_v49  ;;  %720 = vmatmul.f32.gmra.mxu2 %v139_v2 }
  0x63   :  { %1375 = vmatmul.msk.f32.gmra.mxu3 %vm235_vm0, %v148_v23  ;;  %v69_v23 = vld [vmem:[%s2547_s1 + $0x190] sm:$0xff] }
  0x69   :  { %567 = vmatmul.f32.gmra.mxu0 %v37_v52 }
  0x6a   :  { %1322 = vmatmul.msk.f32.gmra.mxu1 %vm235_vm0, %v42_v53  ;;  %723 = vmatmul.f32.gmra.mxu2 %v141_v6  ;;  %v157_v53 = vld [vmem:[%s2547_s1 + $0x450] sm:$0xff]  ;;  %v162_v6 = vld [vmem:[%s2547_s1 + $0x478] sm:$0xff] }
  0x6b   :  { %1376 = vmatmul.msk.f32.gmra.mxu3 %vm235_vm0, %v150_v29 }
  0x71   :  { %570 = vmatmul.f32.gmra.mxu0 %v39_v56 }
  0x72   :  { %1323 = vmatmul.msk.f32.gmra.mxu1 %vm235_vm0, %v44_v57  ;;  %726 = vmatmul.f32.gmra.mxu2 %v143_v11  ;;  %v63_v57 = vld [vmem:[%s2547_s1 + $0x160] sm:$0xff]  ;;  %v72_v11 = vld [vmem:[%s2547_s1 + $0x1a8] sm:$0xff] }
  0x73   :  { %1377 = vmatmul.msk.f32.gmra.mxu3 %vm235_vm0, %v152_v35  ;;  %v76_v35 = vld [vmem:[%s2547_s1 + $0x1c8] sm:$0xff] }
  0x79   :  { %573 = vmatmul.f32.gmra.mxu0 %v41_v60  ;;  %v159_v60 = vld [vmem:[%s2547_s1 + $0x460] sm:$0xff] }
  0x7a   :  { %1324 = vmatmul.msk.f32.gmra.mxu1 %vm235_vm0, %v46_v61  ;;  %729 = vmatmul.f32.gmra.mxu2 %v145_v16  ;;  %v160_v61 = vld [vmem:[%s2547_s1 + $0x468] sm:$0xff] }
  0x7b   :  { %1378 = vmatmul.msk.f32.gmra.mxu3 %vm235_vm0, %v154_v41 }
  0x81   :  { %576 = vmatmul.f32.gmra.mxu0 %v43_v0  ;;  %v65_v0 = vld [vmem:[%s2547_s1 + $0x170] sm:$0xff] }
  0x82   :  { %1325 = vmatmul.msk.f32.gmra.mxu1 %vm235_vm0, %v48_v1  ;;  %732 = vmatmul.f32.gmra.mxu2 %v147_v22  ;;  %v70_v1 = vld [vmem:[%s2547_s1 + $0x198] sm:$0xff] }
  0x83   :  { %1379 = vmatmul.msk.f32.gmra.mxu3 %vm235_vm0, %v156_v47 }
  0x89   :  { %579 = vmatmul.f32.gmra.mxu0 %v45_v4 }
  0x8a   :  { %1326 = vmatmul.msk.f32.gmra.mxu1 %vm235_vm0, %v50_v5  ;;  %735 = vmatmul.f32.gmra.mxu2 %v149_v28  ;;  %v161_v5 = vld [vmem:[%s2547_s1 + $0x470] sm:$0xff] }
  0x8b   :  { %1380 = vmatmul.msk.f32.gmra.mxu3 %vm235_vm0, %v158_v54 }
  0x8f   :  { %v1703_v8 = vpop.f32.mrf.mxu1 }
  0x91   :  { %582 = vmatmul.f32.gmra.mxu0 %v47_v9 }
  0x92   :  { %1327 = vmatmul.msk.f32.gmra.mxu1 %vm235_vm0, %v52_v10  ;;  %738 = vmatmul.f32.gmra.mxu2 %v151_v34  ;;  %v67_v10 = vld [vmem:[%s2547_s1 + $0x180] sm:$0xff] }
  0x93   :  { %1381 = vmatmul.msk.f32.gmra.mxu3 %vm235_vm0, %v160_v61 }
  0x96   :  { %v1008_v3 = vpop.f32.mrf.mxu3 }
  0x97   :  { %v1719_v13 = vpop.f32.mrf.mxu1 }
  0x99   :  { %585 = vmatmul.f32.gmra.mxu0 %v49_v14 }
  0x9a   :  { %1328 = vmatmul.msk.f32.gmra.mxu1 %vm235_vm0, %v54_v15  ;;  %741 = vmatmul.f32.gmra.mxu2 %v153_v40 }
  0x9b   :  { %1382 = vmatmul.msk.f32.gmra.mxu3 %vm235_vm0, %v162_v6 }
  0x9e   :  { %v1735_v18 = vpop.f32.mrf.mxu0  ;;  %v1011_v15 = vpop.f32.mrf.mxu3 }
  0x9f   :  { %v1737_v19 = vpop.f32.mrf.mxu1 }
  0xa1   :  { %588 = vmatmul.f32.gmra.mxu0 %v51_v20  ;;  %v164_v20 = vld [vmem:[%s2547_s1 + $0x488] sm:$0xff] }
  0xa2   :  { %1329 = vmatmul.msk.f32.gmra.mxu1 %vm235_vm0, %v56_v21  ;;  %744 = vmatmul.f32.gmra.mxu2 %v155_v46 }
  0xa3   :  { %1383 = vmatmul.msk.f32.gmra.mxu3 %vm235_vm0, %v164_v20 }
  0xa5   :  { %v1837_v52 = vpop.f32.mrf.mxu2 }
  0xa6   :  { %v1753_v24 = vpop.f32.mrf.mxu0  ;;  %v1014_v28 = vpop.f32.mrf.mxu3 }
  0xa7   :  { %v1755_v25 = vpop.f32.mrf.mxu1 }
  0xa9   :  { %591 = vmatmul.f32.gmra.mxu0 %v53_v26  ;;  %v74_v26 = vld [vmem:[%s2547_s1 + $0x1b8] sm:$0xff] }
  0xaa   :  { %1330 = vmatmul.msk.f32.gmra.mxu1 %vm235_vm0, %v58_v27  ;;  %747 = vmatmul.f32.gmra.mxu2 %v157_v53  ;;  %v168_v53 = vld [vmem:[%s2547_s1 + $0x4a8] sm:$0xff] }
  0xad   :  { %v1855_v59 = vpop.f32.mrf.mxu2 }
  0xae   :  { %v1771_v30 = vpop.f32.mrf.mxu0  ;;  %v1017_v41 = vpop.f32.mrf.mxu3 }
  0xaf   :  { %v1773_v31 = vpop.f32.mrf.mxu1 }
  0xb1   :  { %594 = vmatmul.f32.gmra.mxu0 %v55_v32  ;;  %v71_v32 = vld [vmem:[%s2547_s1 + $0x1a0] sm:$0xff] }
  0xb2   :  { %1331 = vmatmul.msk.f32.gmra.mxu1 %vm235_vm0, %v60_v33  ;;  %750 = vmatmul.f32.gmra.mxu2 %v159_v60 }
  0xb5   :  { %v703_v2 = vpop.f32.mrf.mxu2 }
  0xb6   :  { %v1789_v36 = vpop.f32.mrf.mxu0  ;;  %v1875_v4 = vadd.f32 %v1008_v3, %v703_v2  ;;  %v170_v2 = vld [vmem:[%s2547_s1 + $0x4b8] sm:$0xff] }
  0xb7   :  { %v1791_v37 = vpop.f32.mrf.mxu1 }
  0xb9   :  { %597 = vmatmul.f32.gmra.mxu0 %v57_v38  ;;  %v165_v38 = vld [vmem:[%s2547_s1 + $0x490] sm:$0xff] }
  0xba   :  { %1332 = vmatmul.msk.f32.gmra.mxu1 %vm235_vm0, %v62_v39  ;;  %753 = vmatmul.f32.gmra.mxu2 %v161_v5  ;;  %v166_v39 = vld [vmem:[%s2547_s1 + $0x498] sm:$0xff] }
  0xbb   :  { %1384 = vmatmul.msk.f32.gmra.mxu3 %vm235_vm0, %v166_v39  ;;  %v174_v39 = vld [vmem:[%s2547_s1 + $0x4d8] sm:$0xff] }
  0xbd   :  { %v706_v14 = vpop.f32.mrf.mxu2 }
  0xbe   :  { %v1807_v42 = vpop.f32.mrf.mxu0  ;;  %v1895_v16 = vadd.f32 %v1011_v15, %v706_v14  ;;  %v82_v14 = vld [vmem:[%s2547_s1 + $0x1f8] sm:$0xff]  ;;  %v171_v15 = vld [vmem:[%s2547_s1 + $0x4c0] sm:$0xff] }
  0xbf   :  { %v1809_v43 = vpop.f32.mrf.mxu1 }
  0xc1   :  { %600 = vmatmul.f32.gmra.mxu0 %v59_v44 }
  0xc2   :  { %1333 = vmatmul.msk.f32.gmra.mxu1 %vm235_vm0, %v64_v45  ;;  %756 = vmatmul.f32.gmra.mxu2 %v163_v17  ;;  %v73_v45 = vld [vmem:[%s2547_s1 + $0x1b0] sm:$0xff]  ;;  %v172_v17 = vld [vmem:[%s2547_s1 + $0x4c8] sm:$0xff] }
  0xc3   :  { %1385 = vmatmul.msk.f32.gmra.mxu3 %vm235_vm0, %v168_v53 }
  0xc5   :  { %v709_v27 = vpop.f32.mrf.mxu2 }
  0xc6   :  { %v1825_v48 = vpop.f32.mrf.mxu0  ;;  %v1915_v29 = vadd.f32 %v1014_v28, %v709_v27  ;;  %v79_v27 = vld [vmem:[%s2547_s1 + $0x1e0] sm:$0xff] }
  0xc7   :  { %v1827_v49 = vpop.f32.mrf.mxu1 }
  0xc9   :  { %603 = vmatmul.f32.gmra.mxu0 %v61_v50  ;;  %v78_v50 = vld [vmem:[%s2547_s1 + $0x1d8] sm:$0xff] }
  0xca   :  { %1334 = vmatmul.msk.f32.gmra.mxu1 %vm235_vm0, %v66_v51  ;;  %759 = vmatmul.f32.gmra.mxu2 %v165_v38  ;;  %v167_v51 = vld [vmem:[%s2547_s1 + $0x4a0] sm:$0xff]  ;;  %v173_v38 = vld [vmem:[%s2547_s1 + $0x4d0] sm:$0xff] }
  0xcb   :  { %1386 = vmatmul.msk.f32.gmra.mxu3 %vm235_vm0, %v170_v2 }
  0xcd   :  { %v712_v40 = vpop.f32.mrf.mxu2 }
  0xce   :  { %v1845_v55 = vpop.f32.mrf.mxu0  ;;  %v1935_v44 = vadd.f32 %v1017_v41, %v712_v40 }
  0xcf   :  { %v870_v56 = vpop.f32.mrf.mxu1 }
  0xd1   :  { %606 = vmatmul.f32.gmra.mxu0 %v63_v57 }
  0xd2   :  { %1335 = vmatmul.msk.f32.gmra.mxu1 %vm235_vm0, %v68_v58  ;;  %762 = vmatmul.f32.gmra.mxu2 %v167_v51  ;;  %v75_v58 = vld [vmem:[%s2547_s1 + $0x1c0] sm:$0xff] }
  0xd3   :  { %1387 = vmatmul.msk.f32.gmra.mxu3 %vm235_vm0, %v172_v17 }
  0xd5   :  { %v715_v54 = vpop.f32.mrf.mxu2 }
  0xd6   :  { %v1863_v62 = vpop.f32.mrf.mxu0 }
  0xd7   :  { %v1865_v63 = vpop.f32.mrf.mxu1 }
  0xd9   :  { %609 = vmatmul.f32.gmra.mxu0 %v65_v0  ;;  %v80_v0 = vld [vmem:[%s2547_s1 + $0x1e8] sm:$0xff] }
  0xda   :  { %1336 = vmatmul.msk.f32.gmra.mxu1 %vm235_vm0, %v70_v1  ;;  %v169_v1 = vld [vmem:[%s2547_s1 + $0x4b0] sm:$0xff] }
  0xdb   :  { %765 = vmatmul.f32.gmra.mxu2 %v169_v1  ;;  %1388 = vmatmul.msk.f32.gmra.mxu3 %vm235_vm0, %v174_v39 }
  0xdd   :  { %v718_v3 = vpop.f32.mrf.mxu2 }
  0xde   :  { %v565_v7 = vpop.f32.mrf.mxu0 }
  0xdf   :  { %v1883_v9 = vpop.f32.mrf.mxu1  ;;  %v1892_v12 = vadd.f32 %v870_v56, %v565_v7  ;;  %v1020_v56 = vpop.f32.mrf.mxu3  ;;  %v77_v7 = vld [vmem:[%s2547_s1 + $0x1d0] sm:$0xff] }
  0xe0   :  { %v1955_v57 = vadd.f32 %v1020_v56, %v715_v54  ;;  %v86_v54 = vld [vmem:[%s2547_s1 + $0x218] sm:$0xff]  ;;  %v175_v56 = vld [vmem:[%s2547_s1 + $0x4e0] sm:$0xff] }
  0xe1   :  { %612 = vmatmul.f32.gmra.mxu0 %v67_v10 }
  0xe2   :  { %1337 = vmatmul.msk.f32.gmra.mxu1 %vm235_vm0, %v72_v11 }
  0xe3   :  { %768 = vmatmul.f32.gmra.mxu2 %v171_v15 }
  0xe5   :  { %v721_v20 = vpop.f32.mrf.mxu2 }
  0xe6   :  { %v1903_v21 = vpop.f32.mrf.mxu0 }
  0xe7   :  { %v1905_v22 = vpop.f32.mrf.mxu1  ;;  %v1023_v5 = vpop.f32.mrf.mxu3 }
  0xe8   :  { %v1971_v6 = vadd.f32 %v1023_v5, %v718_v3 }
  0xe9   :  { %615 = vmatmul.f32.gmra.mxu0 %v69_v23 }
  0xea   :  { %1338 = vmatmul.msk.f32.gmra.mxu1 %vm235_vm0, %v74_v26 }
  0xeb   :  { %771 = vmatmul.f32.gmra.mxu2 %v173_v38  ;;  %v865_v38 = vadd.f32 %v1809_v43, %v1845_v55  ;;  %v859_v43 = vadd.f32 %v1773_v31, %v1807_v42  ;;  %v92_v55 = vld [vmem:[%s2547_s1 + $0x248] sm:$0xff]  ;;  %v853_v31 = vadd.f32 %v1737_v19, %v1771_v30  ;;  %v847_v19 = vadd.f32 %v1703_v8, %v1735_v18  ;;  %v94_v30 = vld [vmem:[%s2547_s1 + $0x258] sm:$0xff] }
  0xed   :  { %v724_v40 = vpop.f32.mrf.mxu2 }
  0xee   :  { %v1920_v33 = vpop.f32.mrf.mxu0 }
  0xef   :  { %v1922_v34 = vpop.f32.mrf.mxu1  ;;  %v1026_v23 = vpop.f32.mrf.mxu3 }
  0xf0   :  { %v1987_v26 = vadd.f32 %v1026_v23, %v721_v20  ;;  %v177_v20 = vld [vmem:[%s2547_s1 + $0x4f0] sm:$0xff] }
  0xf1   :  { %618 = vmatmul.f32.gmra.mxu0 %v71_v32 }
  0xf2   :  { %1339 = vmatmul.msk.f32.gmra.mxu1 %vm235_vm0, %v76_v35  ;;  %v84_v35 = vld [vmem:[%s2547_s1 + $0x208] sm:$0xff] }
  0xf3   :  { %774 = vmatmul.f32.gmra.mxu2 %v175_v56 }
  0xf5   :  { %v727_v2 = vpop.f32.mrf.mxu2 }
  0xf6   :  { %v1940_v46 = vpop.f32.mrf.mxu0 }
  0xf7   :  { %v1942_v47 = vpop.f32.mrf.mxu1  ;;  %v1029_v41 = vpop.f32.mrf.mxu3 }
  0xf9   :  { %621 = vmatmul.f32.gmra.mxu0 %v73_v45  ;;  %v2005_v45 = vadd.f32 %v1029_v41, %v724_v40 }
  0xfa   :  { %1340 = vmatmul.msk.f32.gmra.mxu1 %vm235_vm0, %v78_v50  ;;  %v81_v50 = vld [vmem:[%s2547_s1 + $0x1f0] sm:$0xff] }
  0xfb   :  { %777 = vmatmul.f32.gmra.mxu2 %v177_v20 }
  0xfe   :  { %v577_v60 = vpop.f32.mrf.mxu0 }
  0xff   :  { %v888_v61 = vpop.f32.mrf.mxu1  ;;  %v1032_v3 = vpop.f32.mrf.mxu3  ;;  %v883_v17 = vadd.f32 %v1922_v34, %v577_v60  ;;  %v877_v34 = vadd.f32 %v1883_v9, %v1920_v33  ;;  %v90_v9 = vld [vmem:[%s2547_s1 + $0x238] sm:$0xff]  ;;  %v179_v33 = vld [vmem:[%s2547_s1 + $0x500] sm:$0xff] }
 0x100   :  { %v2023_v5 = vadd.f32 %v1032_v3, %v727_v2  ;;  %v730_v60 = vpop.f32.mrf.mxu2  ;;  %v91_v2 = vld [vmem:[%s2547_s1 + $0x240] sm:$0xff] }
 0x101   :  { %624 = vmatmul.f32.gmra.mxu0 %v75_v58  ;;  %v176_v58 = vld [vmem:[%s2547_s1 + $0x4e8] sm:$0xff] }
 0x102   :  { %1341 = vmatmul.msk.f32.gmra.mxu1 %vm235_vm0, %v80_v0  ;;  %1389 = vmatmul.msk.f32.gmra.mxu3 %vm235_vm0, %v176_v58  ;;  %v850_v58 = vadd.f32 %v1719_v13, %v1753_v24  ;;  %v183_v13 = vld [vmem:[%s2547_s1 + $0x520] sm:$0xff]  ;;  %v184_v24 = vld [vmem:[%s2547_s1 + $0x528] sm:$0xff] }
 0x103   :  { %780 = vmatmul.f32.gmra.mxu2 %v179_v33 }
 0x106   :  { %v580_v10 = vpop.f32.mrf.mxu0 }
 0x107   :  { %v891_v11 = vpop.f32.mrf.mxu1  ;;  %v1035_v23 = vpop.f32.mrf.mxu3 }
 0x108   :  { %v733_v39 = vpop.f32.mrf.mxu2 }
 0x109   :  { %627 = vmatmul.f32.gmra.mxu0 %v77_v7  ;;  %v886_v7 = vadd.f32 %v1942_v47, %v580_v10  ;;  %v178_v47 = vld [vmem:[%s2547_s1 + $0x4f8] sm:$0xff]  ;;  %v880_v10 = vadd.f32 %v1905_v22, %v1940_v46 }
 0x10a   :  { %1342 = vmatmul.msk.f32.gmra.mxu1 %vm235_vm0, %v82_v14  ;;  %v83_v14 = vld [vmem:[%s2547_s1 + $0x200] sm:$0xff]  ;;  %1390 = vmatmul.msk.f32.gmra.mxu3 %vm235_vm0, %v178_v47 }
 0x10e   :  { %v583_v28 = vpop.f32.mrf.mxu0 }
 0x10f   :  { %v1992_v32 = vpop.f32.mrf.mxu1  ;;  %v889_v1 = vadd.f32 %v888_v61, %v583_v28  ;;  %v88_v61 = vld [vmem:[%s2547_s1 + $0x228] sm:$0xff]  ;;  %v874_v28 = vadd.f32 %v1865_v63, %v1903_v21  ;;  %v868_v21 = vadd.f32 %v1827_v49, %v1863_v62  ;;  %v1038_v40 = vpop.f32.mrf.mxu3 }
 0x110   :  { %v180_v63 = vld [vmem:[%s2547_s1 + $0x508] sm:$0xff]  ;;  %v2076_v41 = vadd.f32 %v1038_v40, %v733_v39  ;;  %v736_v42 = vpop.f32.mrf.mxu2 }
 0x111   :  { %630 = vmatmul.f32.gmra.mxu0 %v79_v27  ;;  %v2049_v27 = vadd.f32 %v1035_v23, %v730_v60 }
 0x112   :  { %1343 = vmatmul.msk.f32.gmra.mxu1 %vm235_vm0, %v84_v35  ;;  %v85_v35 = vld [vmem:[%s2547_s1 + $0x210] sm:$0xff]  ;;  %1391 = vmatmul.msk.f32.gmra.mxu3 %vm235_vm0, %v180_v63  ;;  %2551 = vst [vmem:[#allocation3_spill] sm:$0xff] %v2076_v41 }
 0x116   :  { %v586_v51 = vpop.f32.mrf.mxu0 }
 0x117   :  { %v2010_v53 = vpop.f32.mrf.mxu1  ;;  %v892_v0 = vadd.f32 %v891_v11, %v586_v51  ;;  %v856_v51 = vadd.f32 %v1755_v25, %v1789_v36 }
 0x118   :  { %v739_v8 = vpop.f32.mrf.mxu2 }
 0x119   :  { %633 = vmatmul.f32.gmra.mxu0 %v81_v50  ;;  %1155 = vmatpush.msrb.mxu2 %v892_v0  ;;  %v862_v50 = vadd.f32 %v1791_v37, %v1825_v48  ;;  %v181_v37 = vld [vmem:[%s2547_s1 + $0x510] sm:$0xff]  ;;  %v182_v48 = vld [vmem:[%s2547_s1 + $0x518] sm:$0xff] }
 0x11a   :  { %1344 = vmatmul.msk.f32.gmra.mxu1 %vm235_vm0, %v86_v54  ;;  %783 = vmatmul.f32.gmra.mxu2 %v181_v37  ;;  %v1041_v54 = vpop.f32.mrf.mxu3  ;;  %v89_v0 = vld [vmem:[%s2547_s1 + $0x230] sm:$0xff] }
 0x11b   :  { %1156 = vmatpush.msrb.mxu2 %v889_v1  ;;  %1392 = vmatmul.msk.f32.gmra.mxu3 %vm235_vm0, %v182_v48  ;;  %v2104_v56 = vadd.f32 %v1041_v54, %v736_v42  ;;  %v102_v54 = vld [vmem:[%s2547_s1 + $0x298] sm:$0xff] }
 0x11d   :  { %1157 = vmatpush.msrb.mxu2 %v886_v7  ;;  %2552 = vst [vmem:[#allocation4_spill] sm:$0xff] %v2104_v56 }
 0x11e   :  { %v2029_v11 = vpop.f32.mrf.mxu0 }
 0x11f   :  { %v2031_v15 = vpop.f32.mrf.mxu1  ;;  %1158 = vmatpush.msrb.mxu2 %v883_v17  ;;  %v185_v17 = vld [vmem:[%s2547_s1 + $0x530] sm:$0xff] }
 0x120   :  { %v742_v20 = vpop.f32.mrf.mxu2 }
 0x121   :  { %636 = vmatmul.f32.gmra.mxu0 %v83_v14  ;;  %1159 = vmatpush.msrb.mxu2 %v880_v10  ;;  %v96_v14 = vld [vmem:[%s2547_s1 + $0x268] sm:$0xff] }
 0x122   :  { %1345 = vmatmul.msk.f32.gmra.mxu1 %vm235_vm0, %v88_v61  ;;  %786 = vmatmul.f32.gmra.mxu2 %v183_v13  ;;  %v1044_v18 = vpop.f32.mrf.mxu3  ;;  %v186_v61 = vld [vmem:[%s2547_s1 + $0x538] sm:$0xff] }
 0x123   :  { %1160 = vmatpush.msrb.mxu2 %v877_v34  ;;  %1393 = vmatmul.msk.f32.gmra.mxu3 %vm235_vm0, %v184_v24  ;;  %v2128_v1 = vadd.f32 %v1044_v18, %v739_v8  ;;  %v93_v34 = vld [vmem:[%s2547_s1 + $0x250] sm:$0xff]  ;;  %v99_v24 = vld [vmem:[%s2547_s1 + $0x280] sm:$0xff] }
 0x125   :  { %1161 = vmatpush.msrb.mxu2 %v874_v28  ;;  %2553 = vst [vmem:[#allocation5_spill] sm:$0xff] %v2128_v1  ;;  %v98_v28 = vld [vmem:[%s2547_s1 + $0x278] sm:$0xff]  ;;  %v116_v1 = vld [vmem:[%s2547_s1 + $0x308] sm:$0xff] }
 0x126   :  { %v2056_v22 = vpop.f32.mrf.mxu0 }
 0x127   :  { %v2058_v46 = vpop.f32.mrf.mxu1  ;;  %1162 = vmatpush.msrb.mxu2 %v1892_v12  ;;  %v87_v12 = vld [vmem:[%s2547_s1 + $0x220] sm:$0xff] }
 0x128   :  { %v745_v33 = vpop.f32.mrf.mxu2 }
 0x129   :  { %639 = vmatmul.f32.gmra.mxu0 %v85_v35  ;;  %1163 = vmatpush.msrb.mxu2 %v868_v21  ;;  %v187_v35 = vld [vmem:[%s2547_s1 + $0x540] sm:$0xff] }
 0x12a   :  { %1346 = vmatmul.msk.f32.gmra.mxu1 %vm235_vm0, %v90_v9  ;;  %789 = vmatmul.f32.gmra.mxu2 %v185_v17  ;;  %v1047_v47 = vpop.f32.mrf.mxu3  ;;  %v188_v9 = vld [vmem:[%s2547_s1 + $0x548] sm:$0xff]  ;;  %v194_v17 = vld [vmem:[%s2547_s1 + $0x578] sm:$0xff] }
 0x12b   :  { %1164 = vmatpush.msrb.mxu2 %v865_v38  ;;  %1394 = vmatmul.msk.f32.gmra.mxu3 %vm235_vm0, %v186_v61  ;;  %v2148_v10 = vadd.f32 %v1047_v47, %v742_v20  ;;  %v95_v38 = vld [vmem:[%s2547_s1 + $0x260] sm:$0xff] }
 0x12d   :  { %1165 = vmatpush.msrb.mxu2 %v862_v50  ;;  %2554 = vst [vmem:[#allocation6_spill] sm:$0xff] %v2148_v10  ;;  %v100_v50 = vld [vmem:[%s2547_s1 + $0x288] sm:$0xff] }
 0x12e   :  { %v2083_v49 = vpop.f32.mrf.mxu0 }
 0x12f   :  { %v2085_v62 = vpop.f32.mrf.mxu1  ;;  %1166 = vmatpush.msrb.mxu2 %v859_v43  ;;  %v190_v43 = vld [vmem:[%s2547_s1 + $0x558] sm:$0xff] }
 0x131   :  { %642 = vmatmul.f32.gmra.mxu0 %v87_v12  ;;  %1167 = vmatpush.msrb.mxu2 %v856_v51  ;;  %v189_v12 = vld [vmem:[%s2547_s1 + $0x550] sm:$0xff] }
 0x132   :  { %1347 = vmatmul.msk.f32.gmra.mxu1 %vm235_vm0, %v92_v55  ;;  %792 = vmatmul.f32.gmra.mxu2 %v187_v35  ;;  %v1050_v63 = vpop.f32.mrf.mxu3  ;;  %v748_v55 = vpop.f32.mrf.mxu2  ;;  %v97_v51 = vld [vmem:[%s2547_s1 + $0x270] sm:$0xff] }
 0x133   :  { %1168 = vmatpush.msrb.mxu2 %v853_v31  ;;  %1395 = vmatmul.msk.f32.gmra.mxu3 %vm235_vm0, %v188_v9  ;;  %v2168_v21 = vadd.f32 %v1050_v63, %v745_v33  ;;  %v106_v33 = vld [vmem:[%s2547_s1 + $0x2b8] sm:$0xff]  ;;  %v195_v63 = vld [vmem:[%s2547_s1 + $0x580] sm:$0xff] }
 0x135   :  { %1169 = vmatpush.msrb.mxu2 %v850_v58  ;;  %2555 = vst [vmem:[#allocation7_spill] sm:$0xff] %v2168_v21  ;;  %v191_v58 = vld [vmem:[%s2547_s1 + $0x560] sm:$0xff] }
 0x136   :  { %v2111_v25 = vpop.f32.mrf.mxu0 }
 0x137   :  { %v2113_v36 = vpop.f32.mrf.mxu1  ;;  %1170 = vmatpush.msrb.mxu2 %v847_v19 }
 0x139   :  { %645 = vmatmul.f32.gmra.mxu0 %v89_v0  ;;  %v192_v0 = vld [vmem:[%s2547_s1 + $0x568] sm:$0xff] }
 0x13a   :  { %1348 = vmatmul.msk.f32.gmra.mxu1 %vm235_vm0, %v94_v30  ;;  %795 = vmatmul.f32.gmra.mxu2 %v189_v12  ;;  %v1053_v37 = vpop.f32.mrf.mxu3  ;;  %v751_v19 = vpop.f32.mrf.mxu2  ;;  %v103_v12 = vld [vmem:[%s2547_s1 + $0x2a0] sm:$0xff] }
 0x13b   :  { %1396 = vmatmul.msk.f32.gmra.mxu3 %vm235_vm0, %v190_v43  ;;  %v2186_v48 = vadd.f32 %v1053_v37, %v748_v55  ;;  %v108_v37 = vld [vmem:[%s2547_s1 + $0x2c8] sm:$0xff] }
 0x13d   :  { %2556 = vst [vmem:[#allocation8_spill] sm:$0xff] %v2186_v48  ;;  %v118_v48 = vld [vmem:[%s2547_s1 + $0x318] sm:$0xff] }
 0x13e   :  { %v2133_v3 = vpop.f32.mrf.mxu0 }
 0x13f   :  { %v2135_v7 = vpop.f32.mrf.mxu1 }
 0x141   :  { %648 = vmatmul.f32.gmra.mxu0 %v91_v2  ;;  %v104_v2 = vld [vmem:[%s2547_s1 + $0x2a8] sm:$0xff] }
 0x142   :  { %1349 = vmatmul.msk.f32.gmra.mxu1 %vm235_vm0, %v96_v14  ;;  %798 = vmatmul.f32.gmra.mxu2 %v191_v58  ;;  %v1056_v30 = vpop.f32.mrf.mxu3  ;;  %v193_v14 = vld [vmem:[%s2547_s1 + $0x570] sm:$0xff]  ;;  %v754_v20 = vpop.f32.mrf.mxu2 }
 0x143   :  { %1397 = vmatmul.msk.f32.gmra.mxu3 %vm235_vm0, %v192_v0  ;;  %v2206_v13 = vadd.f32 %v1056_v30, %v751_v19  ;;  %v105_v19 = vld [vmem:[%s2547_s1 + $0x2b0] sm:$0xff] }
 0x145   :  { %2557 = vst [vmem:[#allocation9_spill] sm:$0xff] %v2206_v13 }
 0x146   :  { %v2153_v60 = vpop.f32.mrf.mxu0 }
 0x147   :  { %v2155_v23 = vpop.f32.mrf.mxu1 }
 0x149   :  { %651 = vmatmul.f32.gmra.mxu0 %v93_v34 }
 0x14a   :  { %1350 = vmatmul.msk.f32.gmra.mxu1 %vm235_vm0, %v98_v28  ;;  %801 = vmatmul.f32.gmra.mxu2 %v193_v14  ;;  %v1059_v47 = vpop.f32.mrf.mxu3  ;;  %v101_v28 = vld [vmem:[%s2547_s1 + $0x290] sm:$0xff]  ;;  %v200_v14 = vld [vmem:[%s2547_s1 + $0x5a8] sm:$0xff] }
 0x14b   :  { %1398 = vmatmul.msk.f32.gmra.mxu3 %vm235_vm0, %v194_v17  ;;  %v2226_v34 = vadd.f32 %v1059_v47, %v754_v20  ;;  %v107_v47 = vld [vmem:[%s2547_s1 + $0x2c0] sm:$0xff] }
 0x14d   :  { %2558 = vst [vmem:[#allocation10_spill] sm:$0xff] %v2226_v34 }
 0x14e   :  { %v2173_v39 = vpop.f32.mrf.mxu0 }
 0x14f   :  { %v918_v40 = vpop.f32.mrf.mxu1 }
 0x151   :  { %654 = vmatmul.f32.gmra.mxu0 %v95_v38  ;;  %v196_v38 = vld [vmem:[%s2547_s1 + $0x588] sm:$0xff] }
 0x152   :  { %1351 = vmatmul.msk.f32.gmra.mxu1 %vm235_vm0, %v100_v50  ;;  %804 = vmatmul.f32.gmra.mxu2 %v195_v63  ;;  %v2248_v50 = vpop.f32.mrf.mxu3  ;;  %v112_v63 = vld [vmem:[%s2547_s1 + $0x2e8] sm:$0xff] }
 0x153   :  { %1399 = vmatmul.msk.f32.gmra.mxu3 %vm235_vm0, %v196_v38  ;;  %2559 = vst [vmem:[#allocation11_spill] sm:$0xff] %v2248_v50  ;;  %v201_v38 = vld [vmem:[%s2547_s1 + $0x5b0] sm:$0xff]  ;;  %v120_v50 = vld [vmem:[%s2547_s1 + $0x328] sm:$0xff] }
 0x156   :  { %v2191_v31 = vpop.f32.mrf.mxu0 }
 0x157   :  { %v2193_v42 = vpop.f32.mrf.mxu1 }
 0x159   :  { %657 = vmatmul.f32.gmra.mxu0 %v97_v51  ;;  %v197_v51 = vld [vmem:[%s2547_s1 + $0x590] sm:$0xff] }
 0x15a   :  { %1352 = vmatmul.msk.f32.gmra.mxu1 %vm235_vm0, %v102_v54  ;;  %v198_v54 = vld [vmem:[%s2547_s1 + $0x598] sm:$0xff]  ;;  %807 = vmatmul.f32.gmra.mxu2 %v197_v51  ;;  %v2270_v0 = vpop.f32.mrf.mxu3 }
 0x15b   :  { %1400 = vmatmul.msk.f32.gmra.mxu3 %vm235_vm0, %v198_v54 }
 0x15e   :  { %v613_v8 = vpop.f32.mrf.mxu0 }
 0x15f   :  { %v2211_v18 = vpop.f32.mrf.mxu1  ;;  %v2223_v61 = vadd.f32 %v918_v40, %v613_v8  ;;  %v2246_v40 = vpop.f32.mrf.mxu2  ;;  %v110_v8 = vld [vmem:[%s2547_s1 + $0x2d8] sm:$0xff] }
 0x161   :  { %660 = vmatmul.f32.gmra.mxu0 %v99_v24 }
 0x162   :  { %1353 = vmatmul.msk.f32.gmra.mxu1 %vm235_vm0, %v104_v2  ;;  %v199_v2 = vld [vmem:[%s2547_s1 + $0x5a0] sm:$0xff]  ;;  %v2292_v20 = vpop.f32.mrf.mxu3 }
 0x163   :  { %810 = vmatmul.f32.gmra.mxu2 %v199_v2  ;;  %1401 = vmatmul.msk.f32.gmra.mxu3 %vm235_vm0, %v200_v14  ;;  %v114_v14 = vld [vmem:[%s2547_s1 + $0x2f8] sm:$0xff] }
 0x166   :  { %v2231_v35 = vpop.f32.mrf.mxu0 }
 0x167   :  { %v2233_v9 = vpop.f32.mrf.mxu1  ;;  %v2268_v58 = vpop.f32.mrf.mxu2 }
 0x169   :  { %663 = vmatmul.f32.gmra.mxu0 %v101_v28 }
 0x16a   :  { %1354 = vmatmul.msk.f32.gmra.mxu1 %vm235_vm0, %v106_v33  ;;  %v1071_v51 = vpop.f32.mrf.mxu3 }
 0x16b   :  { %813 = vmatmul.f32.gmra.mxu2 %v201_v38 }
 0x16e   :  { %v2253_v43 = vpop.f32.mrf.mxu0 }
 0x16f   :  { %v2255_v55 = vpop.f32.mrf.mxu1  ;;  %v2290_v17 = vpop.f32.mrf.mxu2 }
 0x171   :  { %666 = vmatmul.f32.gmra.mxu0 %v103_v12  ;;  %v202_v12 = vld [vmem:[%s2547_s1 + $0x5b8] sm:$0xff] }
 0x172   :  { %1355 = vmatmul.msk.f32.gmra.mxu1 %vm235_vm0, %v108_v37  ;;  %1402 = vmatmul.msk.f32.gmra.mxu3 %vm235_vm0, %v202_v12  ;;  %v1074_v12 = vpop.f32.mrf.mxu3 }
 0x176   :  { %v2275_v30 = vpop.f32.mrf.mxu0 }
 0x177   :  { %v2277_v24 = vpop.f32.mrf.mxu1  ;;  %v766_v37 = vpop.f32.mrf.mxu2 }
 0x178   :  { %v2308_v54 = vadd.f32 %v1071_v51, %v766_v37  ;;  %v111_v51 = vld [vmem:[%s2547_s1 + $0x2e0] sm:$0xff] }
 0x179   :  { %669 = vmatmul.f32.gmra.mxu0 %v105_v19  ;;  %v109_v19 = vld [vmem:[%s2547_s1 + $0x2d0] sm:$0xff] }
 0x17a   :  { %1356 = vmatmul.msk.f32.gmra.mxu1 %vm235_vm0, %v110_v8 }
 0x17e   :  { %v625_v28 = vpop.f32.mrf.mxu0 }
 0x17f   :  { %v936_v33 = vpop.f32.mrf.mxu1  ;;  %v769_v38 = vpop.f32.mrf.mxu2 }
 0x180   :  { %v2324_v37 = vadd.f32 %v1074_v12, %v769_v38  ;;  %v113_v12 = vld [vmem:[%s2547_s1 + $0x2f0] sm:$0xff] }
 0x181   :  { %672 = vmatmul.f32.gmra.mxu0 %v107_v47  ;;  %v203_v47 = vld [vmem:[%s2547_s1 + $0x5c0] sm:$0xff] }
 0x182   :  { %1357 = vmatmul.msk.f32.gmra.mxu1 %vm235_vm0, %v112_v63  ;;  %v204_v63 = vld [vmem:[%s2547_s1 + $0x5c8] sm:$0xff]  ;;  %816 = vmatmul.f32.gmra.mxu2 %v203_v47 }
 0x183   :  { %1403 = vmatmul.msk.f32.gmra.mxu3 %vm235_vm0, %v204_v63  ;;  %v1077_v63 = vpop.f32.mrf.mxu3 }
 0x186   :  { %v628_v8 = vpop.f32.mrf.mxu0 }
 0x187   :  { %v939_v2 = vpop.f32.mrf.mxu1  ;;  %v772_v47 = vpop.f32.mrf.mxu2  ;;  %v934_v34 = vadd.f32 %v2277_v24, %v628_v8  ;;  %v210_v24 = vld [vmem:[%s2547_s1 + $0x5f8] sm:$0xff] }
 0x188   :  { %v2340_v38 = vadd.f32 %v1077_v63, %v772_v47 }
 0x189   :  { %675 = vmatmul.f32.gmra.mxu0 %v109_v19  ;;  %v205_v19 = vld [vmem:[%s2547_s1 + $0x5d0] sm:$0xff] }
 0x18a   :  { %1358 = vmatmul.msk.f32.gmra.mxu1 %vm235_vm0, %v114_v14  ;;  %v206_v14 = vld [vmem:[%s2547_s1 + $0x5d8] sm:$0xff]  ;;  %819 = vmatmul.f32.gmra.mxu2 %v205_v19 }
 0x18b   :  { %1404 = vmatmul.msk.f32.gmra.mxu3 %vm235_vm0, %v206_v14  ;;  %v1080_v63 = vpop.f32.mrf.mxu3 }
 0x18e   :  { %v631_v41 = vpop.f32.mrf.mxu0 }
 0x18f   :  { %v942_v56 = vpop.f32.mrf.mxu1  ;;  %v937_v14 = vadd.f32 %v936_v33, %v631_v41  ;;  %v775_v47 = vpop.f32.mrf.mxu2  ;;  %v115_v41 = vld [vmem:[%s2547_s1 + $0x300] sm:$0xff] }
 0x190   :  { %v2356_v13 = vadd.f32 %v1080_v63, %v775_v47 }
 0x191   :  { %678 = vmatmul.f32.gmra.mxu0 %v111_v51  ;;  %v207_v51 = vld [vmem:[%s2547_s1 + $0x5e0] sm:$0xff] }
 0x192   :  { %1359 = vmatmul.msk.f32.gmra.mxu1 %vm235_vm0, %v116_v1  ;;  %v208_v1 = vld [vmem:[%s2547_s1 + $0x5e8] sm:$0xff]  ;;  %822 = vmatmul.f32.gmra.mxu2 %v207_v51 }
 0x193   :  { %1405 = vmatmul.msk.f32.gmra.mxu3 %vm235_vm0, %v208_v1  ;;  %v1083_v8 = vpop.f32.mrf.mxu3 }
 0x196   :  { %v634_v10 = vpop.f32.mrf.mxu0 }
 0x197   :  { %v945_v21 = vpop.f32.mrf.mxu1  ;;  %v940_v19 = vadd.f32 %v939_v2, %v634_v10  ;;  %v931_v10 = vadd.f32 %v2255_v55, %v625_v28  ;;  %v925_v55 = vadd.f32 %v2211_v18, %v2253_v43  ;;  %v778_v28 = vpop.f32.mrf.mxu2  ;;  %v916_v43 = vadd.f32 %v2155_v23, %v2191_v31  ;;  %v124_v31 = vld [vmem:[%s2547_s1 + $0x348] sm:$0xff] }
 0x198   :  { %v2380_v51 = vadd.f32 %v1083_v8, %v778_v28  ;;  %v907_v23 = vadd.f32 %v2085_v62, %v2133_v3  ;;  %v901_v62 = vadd.f32 %v2031_v15, %v2083_v49  ;;  %v121_v15 = vld [vmem:[%s2547_s1 + $0x330] sm:$0xff] }
 0x199   :  { %681 = vmatmul.f32.gmra.mxu0 %v113_v12  ;;  %1175 = vmatpush.msrb.mxu3 %v940_v19 }
 0x19a   :  { %1360 = vmatmul.msk.f32.gmra.mxu1 %vm235_vm0, %v118_v48  ;;  %v209_v48 = vld [vmem:[%s2547_s1 + $0x5f0] sm:$0xff] }
 0x19b   :  { %1176 = vmatpush.msrb.mxu3 %v937_v14  ;;  %825 = vmatmul.f32.gmra.mxu2 %v209_v48 }
 0x19c   :  { %1406 = vmatmul.msk.f32.gmra.mxu3 %vm235_vm0, %v210_v24 }
 0x19d   :  { %1177 = vmatpush.msrb.mxu3 %v934_v34  ;;  %v928_v34 = vadd.f32 %v2233_v9, %v2275_v30  ;;  %v122_v9 = vld [vmem:[%s2547_s1 + $0x338] sm:$0xff]  ;;  %v1086_v30 = vpop.f32.mrf.mxu3 }
 0x19e   :  { %v637_v2 = vpop.f32.mrf.mxu0 }
 0x19f   :  { %v948_v12 = vpop.f32.mrf.mxu1  ;;  %v2372_v33 = vadd.f32 %v942_v56, %v637_v2  ;;  %1178 = vmatpush.msrb.mxu3 %v931_v10  ;;  %v922_v56 = vadd.f32 %v2193_v42, %v2231_v35  ;;  %v913_v42 = vadd.f32 %v2135_v7, %v2173_v39  ;;  %v781_v35 = vpop.f32.mrf.mxu2  ;;  %v119_v7 = vld [vmem:[%s2547_s1 + $0x320] sm:$0xff]  ;;  %v898_v10 = vadd.f32 %v2010_v53, %v2056_v22 }
 0x1a0   :  { %v2398_v14 = vadd.f32 %v1086_v30, %v781_v35 }
 0x1a1   :  { %684 = vmatmul.f32.gmra.mxu0 %v115_v41  ;;  %1179 = vmatpush.msrb.mxu3 %v928_v34 }
 0x1a2   :  { %1361 = vmatmul.msk.f32.gmra.mxu1 %vm235_vm0, %v120_v50  ;;  %v117_v50 = vld [vmem:[%s2547_s1 + $0x310] sm:$0xff] }
 0x1a3   :  { %1180 = vmatpush.msrb.mxu3 %v925_v55 }
 0x1a5   :  { %1181 = vmatpush.msrb.mxu3 %v922_v56 }
 0x1a6   :  { %v640_v1 = vpop.f32.mrf.mxu0 }
 0x1a7   :  { %v951_v19 = vpop.f32.mrf.mxu1  ;;  %v2390_v18 = vadd.f32 %v945_v21, %v640_v1  ;;  %1182 = vmatpush.msrb.mxu3 %v2223_v61  ;;  %v910_v21 = vadd.f32 %v2113_v36, %v2153_v60  ;;  %v904_v36 = vadd.f32 %v2058_v46, %v2111_v25  ;;  %v784_v3 = vpop.f32.mrf.mxu2  ;;  %v895_v46 = vadd.f32 %v1992_v32, %v2029_v11  ;;  %v126_v25 = vld [vmem:[%s2547_s1 + $0x358] sm:$0xff] }
 0x1a8   :  { %v1089_v60 = vpop.f32.mrf.mxu3 }
 0x1a9   :  { %687 = vmatmul.f32.gmra.mxu0 %v117_v50  ;;  %1183 = vmatpush.msrb.mxu3 %v916_v43  ;;  %v2417_v63 = vadd.f32 %v1089_v60, %v784_v3 }
 0x1aa   :  { %1362 = vmatmul.msk.f32.gmra.mxu1 %vm235_vm0, %v122_v9 }
 0x1ab   :  { %1184 = vmatpush.msrb.mxu3 %v913_v42 }
 0x1ad   :  { %1185 = vmatpush.msrb.mxu3 %v910_v21 }
 0x1ae   :  { %v643_v61 = vpop.f32.mrf.mxu0 }
 0x1af   :  { %v954_v47 = vpop.f32.mrf.mxu1  ;;  %v2410_v39 = vadd.f32 %v948_v12, %v643_v61  ;;  %1186 = vmatpush.msrb.mxu3 %v907_v23  ;;  %v787_v53 = vpop.f32.mrf.mxu2 }
 0x1b0   :  { %v1092_v22 = vpop.f32.mrf.mxu3 }
 0x1b1   :  { %690 = vmatmul.f32.gmra.mxu0 %v119_v7  ;;  %1187 = vmatpush.msrb.mxu3 %v904_v36  ;;  %v2434_v32 = vadd.f32 %v1092_v22, %v787_v53 }
 0x1b2   :  { %1363 = vmatmul.msk.f32.gmra.mxu1 %vm235_vm0, %v124_v31 }
 0x1b3   :  { %1188 = vmatpush.msrb.mxu3 %v901_v62 }
 0x1b5   :  { %1189 = vmatpush.msrb.mxu3 %v898_v10 }
 0x1b6   :  { %v646_v2 = vpop.f32.mrf.mxu0 }
 0x1b7   :  { %v957_v12 = vpop.f32.mrf.mxu1  ;;  %v2426_v41 = vadd.f32 %v951_v19, %v646_v2  ;;  %1190 = vmatpush.msrb.mxu3 %v895_v46 }
 0x1b8   :  { %v1095_v24 = vpop.f32.mrf.mxu3 }
 0x1b9   :  { %1215 = vmatpush.msra.mxu3 %v2049_v27  ;;  %693 = vmatmul.f32.gmra.mxu0 %v121_v15  ;;  %v790_v27 = vpop.f32.mrf.mxu2 }
 0x1ba   :  { %1364 = vmatmul.msk.f32.gmra.mxu1 %vm235_vm0, %v126_v25  ;;  %v2442_v34 = vadd.f32 %v1095_v24, %v790_v27 }
 0x1bb   :  { %1216 = vmatpush.msra.mxu3 %v2023_v5 }
 0x1bd   :  { %1217 = vmatpush.msra.mxu3 %v2005_v45 }
 0x1be   :  { %v649_v11 = vpop.f32.mrf.mxu0 }
 0x1bf   :  { %v960_v49 = vpop.f32.mrf.mxu1  ;;  %v2437_v48 = vadd.f32 %v954_v47, %v649_v11  ;;  %1218 = vmatpush.msra.mxu3 %v1987_v26 }
 0x1c0   :  { %v1098_v26 = vpop.f32.mrf.mxu3 }
 0x1c1   :  { %1219 = vmatpush.msra.mxu3 %v1971_v6  ;;  %v793_v45 = vpop.f32.mrf.mxu2 }
 0x1c2   :  { %v2450_v6 = vadd.f32 %v1098_v26, %v793_v45 }
 0x1c3   :  { %1220 = vmatpush.msra.mxu3 %v1955_v57 }
 0x1c5   :  { %1221 = vmatpush.msra.mxu3 %v1935_v44 }
 0x1c6   :  { %v652_v5 = vpop.f32.mrf.mxu0 }
 0x1c7   :  { %v963_v55 = vpop.f32.mrf.mxu1  ;;  %v2445_v28 = vadd.f32 %v957_v12, %v652_v5  ;;  %1222 = vmatpush.msra.mxu3 %v1915_v29 }
 0x1c8   :  { %v1101_v44 = vpop.f32.mrf.mxu3 }
 0x1c9   :  { %1223 = vmatpush.msra.mxu3 %v1895_v16  ;;  %v796_v1 = vpop.f32.mrf.mxu2 }
 0x1ca   :  { %v2454_v19 = vadd.f32 %v1101_v44, %v796_v1 }
 0x1cb   :  { %1224 = vmatpush.msra.mxu3 %v1875_v4 }
 0x1ce   :  { %v655_v8 = vpop.f32.mrf.mxu0 }
 0x1cf   :  { %v966_v57 = vpop.f32.mrf.mxu1  ;;  %v2452_v56 = vadd.f32 %v960_v49, %v655_v8  ;;  %v2481_v8 = vld [vmem:[%s2548_s2] sm:$0x3f] }
 0x1d0   :  { %v1104_v42 = vpop.f32.mrf.mxu3  ;;  %v1143_v1 = vperm.slane %v2481_v8, 0 }
 0x1d1   :  { %v799_v29 = vpop.f32.mrf.mxu2 }
 0x1d2   :  { %v2456_v16 = vadd.f32 %v1104_v42, %v799_v29  ;;  %1171 = vmatmul.f32.vlgmr.msrb.gmra.mxu2 %v1143_v1 }
 0x1d6   :  { %v658_v9 = vpop.f32.mrf.mxu0 }
 0x1d7   :  { %v969_v50 = vpop.f32.mrf.mxu1  ;;  %v964_v43 = vadd.f32 %v963_v55, %v658_v9 }
 0x1d8   :  { %v1107_v61 = vpop.f32.mrf.mxu3 }
 0x1d9   :  { %v802_v21 = vpop.f32.mrf.mxu2 }
 0x1da   :  { %v2458_v47 = vadd.f32 %v1107_v61, %v802_v21 }
 0x1de   :  { %v661_v35 = vpop.f32.mrf.mxu0 }
 0x1df   :  { %v972_v30 = vpop.f32.mrf.mxu1  ;;  %v967_v4 = vadd.f32 %v966_v57, %v661_v35 }
 0x1e0   :  { %v1110_v36 = vpop.f32.mrf.mxu3 }
 0x1e1   :  { %v805_v7 = vpop.f32.mrf.mxu2 }
 0x1e2   :  { %v2460_v62 = vadd.f32 %v1110_v36, %v805_v7  ;;  %v1144_v36 = vperm.slane %v2481_v8, 1 }
 0x1e4   :  { %1191 = vmatmul.f32.vlgmr.msrb.gmra.mxu3 %v1144_v36 }
 0x1e6   :  { %v664_v23 = vpop.f32.mrf.mxu0 }
 0x1e7   :  { %v975_v31 = vpop.f32.mrf.mxu1 }
 0x1e8   :  { %v2464_v15 = vpop.f32.mrf.mxu3 }
 0x1e9   :  { %v2462_v25 = vpop.f32.mrf.mxu2 }
 0x1ea   :  { %v1114_v1 = vadd.f32 %v2464_v15, %v2462_v25 }
 0x1ee   :  { %v667_v3 = vpop.f32.mrf.mxu0 }
 0x1ef   :  { %v978_v60 = vpop.f32.mrf.mxu1 }
 0x1f0   :  { %v2468_v49 = vpop.f32.mrf.mxu3 }
 0x1f1   :  { %v2466_v11 = vpop.f32.mrf.mxu2 }
 0x1f6   :  { %v670_v10 = vpop.f32.mrf.mxu0 }
 0x1f7   :  { %v981_v2 = vpop.f32.mrf.mxu1  ;;  %v976_v21 = vadd.f32 %v975_v31, %v670_v10  ;;  %v9_v31 = vstv %s2549_s3 }
 0x1f8   :  { %v2474_v55 = vpop.f32.mrf.mxu3  ;;  %10 = vst [vmem:[#allocation2] sm:$0x1] %v9_v31 }
 0x1f9   :  { %v2472_v5 = vpop.f32.mrf.mxu2 }
 0x1fe   :  { %v673_v12 = vpop.f32.mrf.mxu0 }
 0x1ff   :  { %v984_v46 = vpop.f32.mrf.mxu1  ;;  %v979_v29 = vadd.f32 %v978_v60, %v673_v12 }
 0x205   :  { %v2484_v61 = vpop.f32.mrf.mxu2 }
 0x206   :  { %v676_v53 = vpop.f32.mrf.mxu0  ;;  %v2486_v7 = vpop.f32.mrf.mxu3 }
 0x207   :  { %v987_v22 = vpop.f32.mrf.mxu1  ;;  %v982_v9 = vadd.f32 %v981_v2, %v676_v53 }
 0x20d   :  { %v820_v60 = vpop.f32.mrf.mxu2 }
 0x20e   :  { %v679_v27 = vpop.f32.mrf.mxu0  ;;  %v1125_v12 = vpop.f32.mrf.mxu3 }
 0x20f   :  { %v2470_v24 = vpop.f32.mrf.mxu1  ;;  %v985_v44 = vadd.f32 %v984_v46, %v679_v27  ;;  %v970_v46 = vadd.f32 %v969_v50, %v664_v23  ;;  %v1438_v50 = vmov 0  }
 0x210   :  { %1433 = vset.pattern.permute.xlu0 %v1438_v50 }
 0x216   :  { %v682_v45 = vpop.f32.mrf.mxu0  ;;  %v1128_v23 = vpop.f32.mrf.mxu3 }
 0x217   :  { %v2476_v26 = vpop.f32.mrf.mxu1  ;;  %v988_v57 = vadd.f32 %v987_v22, %v682_v45  ;;  %v973_v22 = vadd.f32 %v972_v30, %v667_v3 }
 0x219   :  { %1195 = vmatpush.msra.mxu2 %v988_v57 }
 0x21b   :  { %1196 = vmatpush.msra.mxu2 %v985_v44  ;;  %v2564_v44 = vld [vmem:[#allocation7_spill] sm:$0xff] }
 0x21d   :  { %1197 = vmatpush.msra.mxu2 %v982_v9  ;;  %v2565_v9 = vld [vmem:[#allocation6_spill] sm:$0xff] }
 0x21e   :  { %v685_v35 = vpop.f32.mrf.mxu0 }
 0x21f   :  { %v996_v42 = vpop.f32.mrf.mxu1  ;;  %1198 = vmatpush.msra.mxu2 %v979_v29  ;;  %v1131_v45 = vpop.f32.mrf.mxu3  ;;  %v2566_v29 = vld [vmem:[#allocation5_spill] sm:$0xff] }
 0x221   :  { %1199 = vmatpush.msra.mxu2 %v976_v21 }
 0x223   :  { %1200 = vmatpush.msra.mxu2 %v973_v22 }
 0x225   :  { %1201 = vmatpush.msra.mxu2 %v970_v46 }
 0x226   :  { %v688_v53 = vpop.f32.mrf.mxu0 }
 0x227   :  { %v999_v2 = vpop.f32.mrf.mxu1  ;;  %1202 = vmatpush.msra.mxu2 %v967_v4  ;;  %v823_v4 = vpop.f32.mrf.mxu2 }
 0x228   :  { %v1129_v57 = vadd.f32 %v1128_v23, %v823_v4 }
 0x229   :  { %1203 = vmatpush.msra.mxu2 %v964_v43  ;;  %v1135_v43 = vld [vmem:[#allocation2] sm:$0x1] }
 0x22a   :  { %1138 = vperm.xlu0 %1433, %v1135_v43  }
 0x22b   :  { %1204 = vmatpush.msra.mxu2 %v2452_v56  ;;  %v1145_v56 = vperm.slane %v2481_v8, 2 }
 0x22d   :  { %1205 = vmatpush.msra.mxu2 %v2445_v28 }
 0x22e   :  { %v691_v3 = vpop.f32.mrf.mxu0 }
 0x22f   :  { %v1002_v30 = vpop.f32.mrf.mxu1  ;;  %1206 = vmatpush.msra.mxu2 %v2437_v48  ;;  %v826_v27 = vpop.f32.mrf.mxu2 }
 0x230   :  { %v1003_v48 = vadd.f32 %v1002_v30, %v1837_v52  ;;  %v1069_v52 = vadd.f32 %v2292_v20, %v2290_v17  ;;  %v1126_v17 = vadd.f32 %v1125_v12, %v820_v60  ;;  %v1123_v20 = vadd.f32 %v2486_v7, %v2484_v61 }
 0x231   :  { %1207 = vmatpush.msra.mxu2 %v2426_v41 }
 0x233   :  { %1208 = vmatpush.msra.mxu2 %v2410_v39 }
 0x235   :  { %1209 = vmatpush.msra.mxu2 %v2390_v18  ;;  %v997_v18 = vadd.f32 %v996_v42, %v691_v3 }
 0x236   :  { %v694_v41 = vpop.f32.mrf.mxu0 }
 0x237   :  { %v1005_v10 = vpop.f32.mrf.mxu1  ;;  %1210 = vmatpush.msra.mxu2 %v2372_v33  ;;  %v1000_v39 = vadd.f32 %v999_v2, %v694_v41  ;;  %v1132_v33 = vadd.f32 %v1131_v45, %v826_v27 }
 0x238   :  { %v1006_v28 = vadd.f32 %v1005_v10, %v1855_v59  ;;  %1211 = vmatmul.f32.vlgmr.msra.gmra.mxu2 %v1145_v56  ;;  %v994_v59 = vadd.f32 %v2476_v26, %v688_v53 }
 0x239   :  { %1235 = vmatpush.msrb.mxu2 %v2380_v51  ;;  %v1066_v51 = vadd.f32 %v2270_v0, %v2268_v58  ;;  %v1120_v58 = vadd.f32 %v2474_v55, %v2472_v5  ;;  %v2562_v0 = vld [vmem:[#allocation9_spill] sm:$0xff]  ;;  %v1147_v5 = vperm.slane %v2481_v8, 4  ;;  %v2567_v55 = vld [vmem:[#allocation4_spill] sm:$0xff] }
 0x23a   :  { %1225 = vmatpush.msra.mxu3 %v1006_v28 }
 0x23b   :  { %1236 = vmatpush.msrb.mxu2 %v2356_v13  ;;  %v991_v13 = vadd.f32 %v2470_v24, %v685_v35  ;;  %v2563_v24 = vld [vmem:[#allocation8_spill] sm:$0xff] }
 0x23c   :  { %1226 = vmatpush.msra.mxu3 %v1003_v48 }
 0x23d   :  { %1237 = vmatpush.msrb.mxu2 %v2340_v38  ;;  %v1146_v38 = vperm.slane %v2481_v8, 3 }
 0x23e   :  { %1227 = vmatpush.msra.mxu3 %v1000_v39 }
 0x23f   :  { %1238 = vmatpush.msrb.mxu2 %v2324_v37  ;;  %v2560_v37 = vld [vmem:[#allocation11_spill] sm:$0xff] }
 0x240   :  { %1228 = vmatpush.msra.mxu3 %v997_v18  ;;  %v1063_v26 = vadd.f32 %v2560_v37, %v2246_v40  ;;  %v1117_v40 = vadd.f32 %v2468_v49, %v2466_v11  ;;  %v2568_v11 = vld [vmem:[#allocation3_spill] sm:$0xff] }
 0x241   :  { %1239 = vmatpush.msrb.mxu2 %v2308_v54  ;;  %v2561_v54 = vld [vmem:[#allocation10_spill] sm:$0xff] }
 0x242   :  { %1229 = vmatpush.msra.mxu3 %v994_v59 }
 0x243   :  { %1240 = vmatpush.msrb.mxu2 %v1069_v52 }
 0x244   :  { %1230 = vmatpush.msra.mxu3 %v991_v13 }
 0x245   :  { %1241 = vmatpush.msrb.mxu2 %v1066_v51  ;;  %1231 = vmatmul.f32.vlgmr.msra.gmra.mxu3 %v1146_v38 }
 0x246   :  { %1255 = vmatpush.msrb.mxu3 %v1132_v33 }
 0x247   :  { %1242 = vmatpush.msrb.mxu2 %v1063_v26 }
 0x248   :  { %1256 = vmatpush.msrb.mxu3 %v1129_v57 }
 0x249   :  { %1243 = vmatpush.msrb.mxu2 %v2561_v54 }
 0x24a   :  { %1257 = vmatpush.msrb.mxu3 %v1126_v17 }
 0x24b   :  { %1244 = vmatpush.msrb.mxu2 %v2562_v0 }
 0x24c   :  { %1258 = vmatpush.msrb.mxu3 %v1123_v20 }
 0x24d   :  { %1245 = vmatpush.msrb.mxu2 %v2563_v24 }
 0x24e   :  { %1259 = vmatpush.msrb.mxu3 %v1120_v58 }
 0x24f   :  { %1246 = vmatpush.msrb.mxu2 %v2564_v44 }
 0x250   :  { %1260 = vmatpush.msrb.mxu3 %v1117_v40 }
 0x251   :  { %1247 = vmatpush.msrb.mxu2 %v2565_v9 }
 0x252   :  { %1261 = vmatpush.msrb.mxu3 %v1114_v1 }
 0x253   :  { %1248 = vmatpush.msrb.mxu2 %v2566_v29 }
 0x254   :  { %1262 = vmatpush.msrb.mxu3 %v2460_v62  ;;  %v1148_v62 = vperm.slane %v2481_v8, 5 }
 0x255   :  { %1249 = vmatpush.msrb.mxu2 %v2567_v55 }
 0x256   :  { %1263 = vmatpush.msrb.mxu3 %v2458_v47  ;;  %v1172_v47 = vpop.f32.mrf.mxu2 }
 0x257   :  { %1250 = vmatpush.msrb.mxu2 %v2568_v11 }
 0x258   :  { %1264 = vmatpush.msrb.mxu3 %v2456_v16  ;;  %1251 = vmatmul.f32.vlgmr.msrb.gmra.mxu2 %v1147_v5 }
 0x25a   :  { %1265 = vmatpush.msrb.mxu3 %v2454_v19 }
 0x25c   :  { %1266 = vmatpush.msrb.mxu3 %v2450_v6 }
 0x25e   :  { %1267 = vmatpush.msrb.mxu3 %v2442_v34 }
 0x260   :  { %1268 = vmatpush.msrb.mxu3 %v2434_v32 }
 0x262   :  { %1269 = vmatpush.msrb.mxu3 %v2417_v63 }
 0x264   :  { %1270 = vmatpush.msrb.mxu3 %v2398_v14 }
 0x265   :  { %1271 = vmatmul.f32.vlgmr.msrb.gmra.mxu3 %v1148_v62 }
 0x267   :  { %v1192_v16 = vpop.f32.mrf.mxu3 }
 0x29c   :  { %v1139_v25 = vpop.permute.xlu0 %1138 }
 0x29d   :  { %v1141_v15 = vperm.slane %v1139_v25, 0 }
 0x29f   :  { %v1173_v49 = vadd.f32 %v1172_v47, %v1141_v15 }
 0x2a1   :  { %v1193_v19 = vadd.f32 %v1192_v16, %v1173_v49 }
 0x2bb   :  { %v1212_v42 = vpop.f32.mrf.mxu2 }
 0x2bc   :  { %v1213_v6 = vadd.f32 %v1212_v42, %v1193_v19 }
 0x2c8   :  { %v1232_v35 = vpop.f32.mrf.mxu3 }
 0x2c9   :  { %v1233_v34 = vadd.f32 %v1232_v35, %v1213_v6 }
 0x2db   :  { %v1252_v21 = vpop.f32.mrf.mxu2 }
 0x2dc   :  { %v1253_v61 = vadd.f32 %v1252_v21, %v1233_v34 }
 0x2e8   :  { %v1272_v32 = vpop.f32.mrf.mxu3 }
 0x2e9   :  { %v1273_v7 = vadd.f32 %v1272_v32, %v1253_v61 }
 0x2eb   :  { %v1407_v8 = vmul.f32 -1.442695, %v1273_v7 }
 0x2ed   :  { %1434 = vpow2.f32 %v1407_v8 }
 0x2f3   :  { %v1435_v63 = vpop.eup %1434 }
 0x2f4   :  { %v1278_v36 = vadd.f32 1.0, %v1435_v63 }
 0x2f6   :  { %1436 = vrcp.f32 %v1278_v36  ;;  %v1290_v2 = vand.u32 2147483648, %v1278_v36  ;;  %v1288_v60 = vand.u32 2147483647, %v1278_v36  ;;  %vm1284_vm2 = vweird.f32 %v1278_v36 }
 0x2f8   :  { %v1291_v31 = vor.u32 1.1754944e-38, %v1290_v2  ;;  %vm1289_vm4 = vcmp.eq.f32.partialorder %v1288_v60, 8.507059e+37 }
 0x2fc   :  { %v1437_v14 = vpop.eup %1436 }
 0x2fd   :  { %v1280_v22 = vmul.f32 %v1437_v14, %v1278_v36  ;;  %vm1285_vm1 = vweird.f32 %v1437_v14 }
 0x2fe   :  { %vm1286_vm3 = vmor %vm1284_vm2, %vm1285_vm1 }
 0x2ff   :  { %v1281_v46 = vsub.f32 1.0, %v1280_v22 }
 0x301   :  { %v1282_v53 = vmul.f32 %v1437_v14, %v1281_v46 }
 0x303   :  { %v1283_v12 = vadd.f32 %v1437_v14, %v1282_v53 }
 0x305   :  { %v1287_v30 = vsel %vm1286_vm3, %v1437_v14, %v1283_v12 }
 0x306   :  { %v1292_v3 = vsel %vm1289_vm4, %v1291_v31, %v1287_v30 }
 0x307   :  { %v1294_v50 = vsub.f32 1.0, %v1292_v3  ;;  %v1296_v43 = vrot.slane %v1292_v3, 7 }
 0x309   :  { %v1299_v4 = vrot.slane %v1294_v50, 6  ;;  %v1302_v23 = vsel %vm1301_vm5, %v1273_v7, %v1296_v43 }
 0x30b   :  { %v1304_v56 = vsel %vm1303_vm6, %v1302_v23, %v1299_v4 }
 0x30c   :  { %1306 = vst.msk [vmem:[%s2550_s4] sm:$0x7] %vm1305_vm7, %v1304_v56 }

</bundles_post_ra>
